<compile_context>
chip_gen: v5e
topology: v5e:2x2
jax: 0.10.0
libtpu: 0.0.40
codegen_flags: <defaults>
</compile_context>

<pallas_src>
import math

import jax
import jax.numpy as jnp
from jax import lax
from jax.experimental import pallas as pl
from jax.experimental.pallas import tpu as pltpu

_LANE = 128
_SUBLANE = 8


def _round_up(x, m):
    return (x + m - 1) // m * m


def _gru_chunk_kernel(gi_ref, h0_ref, whh_ref, bhn_ref, out_ref, h_ref):
    """One grid step == one chunk of Tc GRU time steps.

    gi_ref  : (Tc, 3Hp) f32   precomputed x@W_ih^T + [b_ir+b_hr | b_iz+b_hz | b_in]
    h0_ref  : (1, Hp)   f32   initial hidden state
    whh_ref : (Hp, 3Hp) bf16  recurrent weights, gate-block aligned, zero-padded
    bhn_ref : (1, Hp)   f32   b_hn
    out_ref : (Tc, Hp)  f32   hidden state for every step of the chunk
    h_ref   : (1, Hp)   f32   VMEM scratch carrying h across chunks
    """
    c = pl.program_id(0)
    Tc = gi_ref.shape[0]
    Hp = h_ref.shape[-1]

    # Correct only because the (single) time-chunk axis is sequential
    # ("arbitrary").  Never flip this grid axis to "parallel".
    @pl.when(c == 0)
    def _():
        h_ref[...] = h0_ref[...]

    whh = whh_ref[...]   # resident bf16 weights, one load per chunk
    bhn = bhn_ref[...]   # (1, Hp): same shape as h -> no per-step broadcast

    def step(i, h):
        gi = gi_ref[pl.ds(i, 1), :]                          # (1, 3Hp) f32
        # bf16 MXU operands, f32 accumulation; gate math stays f32.
        gh = jnp.dot(h.astype(jnp.bfloat16), whh,
                     preferred_element_type=jnp.float32)     # (1, 3Hp) f32
        rz = jax.nn.sigmoid(gi[:, :2 * Hp] + gh[:, :2 * Hp])
        r = rz[:, :Hp]
        z = rz[:, Hp:]
        n = jnp.tanh(gi[:, 2 * Hp:] + r * (gh[:, 2 * Hp:] + bhn))
        new_h = n + z * (h - n)                              # == (1-z)*n + z*h
        out_ref[pl.ds(i, 1), :] = new_h
        return new_h

    # NOTE: padded lanes (>= real H) of h stay exactly 0 through the
    # recurrence because the padded weight columns and biases are 0
    # (sigmoid(0)=0.5 only ever multiplies 0 there).  Nothing may read the
    # padded lanes as "real" data.
    h_ref[...] = lax.fori_loop(0, Tc, step, h_ref[...], unroll=True)


@jax.jit
def gru_sequence(x_seq, h0, wih_p, b_gi, whh_bf16, bhn):
    """Run a full GRU sequence with a single Pallas kernel launch.

    x_seq    : (T, H)    f32 per-step inputs (embeddings)
    h0       : (H,)      f32 initial hidden state
    wih_p    : (Hp, 3Hp) f32 padded/transposed weight_ih_l0 (gate-block aligned)
    b_gi     : (1, 3Hp)  f32 [b_ir+b_hr | b_iz+b_hz | b_in], padded
    whh_bf16 : (Hp, 3Hp) bf16 padded/transposed weight_hh_l0
    bhn      : (1, Hp)   f32 b_hn, padded
    returns (T, H) hidden states (output_t == hidden_t for a 1-layer GRU).
    """
    T, H = x_seq.shape
    Hp = wih_p.shape[0]

    Tc = min(64, _round_up(T, _SUBLANE))      # steps per grid point
    T_pad = _round_up(T, Tc)

    # Hoisted non-recurrent projection: one batched matmul for all T steps
    # (M = T_pad rows on the MXU instead of per-step M = 1).
    x_pad = jnp.zeros((T_pad, Hp), jnp.float32).at[:T, :H].set(
        x_seq.astype(jnp.float32))
    gi_all = jnp.dot(x_pad, wih_p, preferred_element_type=jnp.float32) + b_gi

    h0p = jnp.zeros((1, Hp), jnp.float32).at[0, :H].set(h0.astype(jnp.float32))

    const = lambda c: (0, 0)   # VMEM-resident across the whole grid
    out = pl.pallas_call(
        _gru_chunk_kernel,
        out_shape=jax.ShapeDtypeStruct((T_pad, Hp), jnp.float32),
        grid=(T_pad // Tc,),
        in_specs=[
            pl.BlockSpec((Tc, 3 * Hp), lambda c: (c, 0)),   # gi stream
            pl.BlockSpec((1, Hp), const),                   # h0
            pl.BlockSpec((Hp, 3 * Hp), const),              # W_hh^T (bf16)
            pl.BlockSpec((1, Hp), const),                   # b_hn
        ],
        out_specs=pl.BlockSpec((Tc, Hp), lambda c: (c, 0)),
        scratch_shapes=[pltpu.VMEM((1, Hp), jnp.float32)],
        compiler_params=pltpu.CompilerParams(
            dimension_semantics=("arbitrary",)),            # serial recurrence
    )(gi_all, h0p, whh_bf16, bhn)

    return out[:T, :H]


def _gru_step_ref(x, h, w_ih_t, w_hh_t, b_ih, b_hh):
    """Pure-JAX f32 single-step reference (PyTorch GRU semantics)."""
    H = x.shape[-1]
    gi = x @ w_ih_t + b_ih
    gh = h @ w_hh_t + b_hh
    r = jax.nn.sigmoid(gi[:H] + gh[:H])
    z = jax.nn.sigmoid(gi[H:2 * H] + gh[H:2 * H])
    n = jnp.tanh(gi[2 * H:] + r * gh[2 * H:])
    return (1.0 - z) * n + z * h


class EncoderEmbeddingRNNPallas:
    """JAX/Pallas port of EncoderEmbeddingRNN."""

    def __init__(self, input_size, hidden_size, word_vector, key):
        self.hidden_size = hidden_size
        self.word_vector = word_vector
        self.empty_vector = jnp.zeros((hidden_size,), jnp.float32)

        H = hidden_size
        Hp = _round_up(max(H, _LANE), _LANE)
        self._Hp = Hp

        # nn.GRU default init: U(-k, k), k = 1/sqrt(H).
        k = 1.0 / math.sqrt(H)
        k1, k2, k3, k4 = jax.random.split(key, 4)
        w_ih = jax.random.uniform(k1, (3 * H, H), jnp.float32, -k, k)  # weight_ih_l0
        w_hh = jax.random.uniform(k2, (3 * H, H), jnp.float32, -k, k)  # weight_hh_l0
        b_ih = jax.random.uniform(k3, (3 * H,), jnp.float32, -k, k)
        b_hh = jax.random.uniform(k4, (3 * H,), jnp.float32, -k, k)

        # Un-padded transposed copies kept for the pure-JAX reference.
        self.w_ih_t = w_ih.T                     # (H, 3H)
        self.w_hh_t = w_hh.T
        self.b_ih = b_ih
        self.b_hh = b_hh

        # Padded, gate-block-aligned parameters (built once).
        def pad_w(w_t):
            wp = jnp.zeros((Hp, 3 * Hp), jnp.float32)
            for g in range(3):
                wp = wp.at[:H, g * Hp:g * Hp + H].set(w_t[:, g * H:(g + 1) * H])
            return wp

        # Input projection weights stay f32 (used in one hoisted XLA matmul);
        # recurrent weights stored bf16 for single-pass MXU operands in-kernel.
        self._wih_p = pad_w(self.w_ih_t)
        self._whh_bf16 = pad_w(self.w_hh_t).astype(jnp.bfloat16)

        b_gi = jnp.zeros((1, 3 * Hp), jnp.float32)
        b_gi = b_gi.at[0, :H].set(b_ih[:H] + b_hh[:H])                       # r
        b_gi = b_gi.at[0, Hp:Hp + H].set(b_ih[H:2 * H] + b_hh[H:2 * H])      # z
        b_gi = b_gi.at[0, 2 * Hp:2 * Hp + H].set(b_ih[2 * H:])               # n (b_in)
        self._b_gi = b_gi

        bhn = jnp.zeros((1, Hp), jnp.float32)
        bhn = bhn.at[0, :H].set(b_hh[2 * H:])                                # b_hn
        self._bhn = bhn

    def _embed(self, word):
        if word in self.word_vector:
            return jnp.asarray(self.word_vector[word], jnp.float32).reshape(-1)
        return self.empty_vector

    def forward(self, input, hidden):
        """Single-token step — same interface/semantics as the PyTorch module.

        TODO(synk): token-by-token decoding should prefer encode_sequence (or
        keep the hidden state on-device via input_output_aliases); a per-token
        pallas_call is dominated by dispatch + host round-trip of h.
        """
        x = self._embed(input).reshape(1, -1)                     # (1, H)
        h0 = jnp.asarray(hidden, jnp.float32).reshape(-1)         # (H,)
        outs = gru_sequence(x, h0, self._wih_p, self._b_gi,
                            self._whh_bf16, self._bhn)            # (1, H)
        out = outs.reshape(1, 1, self.hidden_size)
        return out, out     # output == hidden for a 1-layer GRU single step

    def encode_sequence(self, words, hidden):
        """Fast path: the whole token sequence in one Pallas kernel launch."""
        x_seq = jnp.stack([self._embed(w) for w in words])        # (T, H)
        h0 = jnp.asarray(hidden, jnp.float32).reshape(-1)
        outs = gru_sequence(x_seq, h0, self._wih_p, self._b_gi,
                            self._whh_bf16, self._bhn)            # (T, H)
        outputs = outs.reshape(len(words), 1, self.hidden_size)
        new_hidden = outs[-1].reshape(1, 1, self.hidden_size)
        return outputs, new_hidden

    def initHidden(self):
        return jnp.zeros((1, 1, self.hidden_size), jnp.float32)


if __name__ == "__main__":
    hidden_size = 32
    key = jax.random.PRNGKey(0)
    k_model, k_words = jax.random.split(key)

    # Small deterministic word -> embedding table (embedding size == hidden_size).
    words = ["hello", "world", "pallas"]
    wkeys = jax.random.split(k_words, len(words))
    word_vector = {w: jax.random.normal(wk, (hidden_size,), jnp.float32)
                   for w, wk in zip(words, wkeys)}

    enc = EncoderEmbeddingRNNPallas(hidden_size, hidden_size, word_vector, k_model)

    # Sequence includes an out-of-vocab token (empty-vector fallback).
    seq = ["hello", "not_in_vocab", "world", "pallas", "hello"]   # T = 5

    # Fast path: one kernel launch for the whole sequence.
    outputs, hidden_seq = enc.encode_sequence(seq, enc.initHidden())

    # Original per-token interface, chaining the hidden state.
    hidden = enc.initHidden()
    for w in seq:
        out, hidden = enc.forward(w, hidden)
    jax.block_until_ready((outputs, hidden_seq, hidden))

    # Pure-JAX f32 reference chain for correctness.
    h_ref = jnp.zeros((hidden_size,), jnp.float32)
    ref_outs = []
    for w in seq:
        h_ref = _gru_step_ref(enc._embed(w), h_ref,
                              enc.w_ih_t, enc.w_hh_t, enc.b_ih, enc.b_hh)
        ref_outs.append(h_ref)
    ref_outs = jnp.stack(ref_outs)

    assert outputs.shape == (len(seq), 1, hidden_size)
    assert hidden_seq.shape == (1, 1, hidden_size)
    assert hidden.shape == (1, 1, hidden_size)
    # bf16 recurrent matmul (f32 accumulation) vs. all-f32 reference -> loose tol.
    assert jnp.allclose(outputs.reshape(len(seq), hidden_size), ref_outs,
                        atol=2e-2, rtol=2e-2), "sequence GRU mismatch"
    assert jnp.allclose(hidden.reshape(-1), ref_outs[-1],
                        atol=2e-2, rtol=2e-2), "per-token GRU mismatch"
    assert jnp.allclose(hidden_seq.reshape(-1), hidden.reshape(-1),
                        atol=2e-2, rtol=2e-2), "seq vs per-token mismatch"

    print("KERNEL_OK")
</pallas_src>

<mosaic_0001>
module attributes {stable_mosaic.version = 11 : i64} {
  func.func @_gru_chunk_kernel(%arg0: i32, %arg1: memref<8x384xf32, #tpu.memory_space<vmem>>, %arg2: memref<1x128xf32, #tpu.memory_space<vmem>>, %arg3: memref<128x384xbf16, #tpu.memory_space<vmem>>, %arg4: memref<1x128xf32, #tpu.memory_space<vmem>>, %arg5: memref<8x128xf32, #tpu.memory_space<vmem>>, %arg6: memref<1x128xf32, #tpu.memory_space<vmem>>) attributes {dimension_semantics = [#tpu.dimension_semantics<arbitrary>], iteration_bounds = array<i64: 1>, scalar_prefetch = 0 : i64, scratch_operands = 1 : i64, tpu.core_type = #tpu.core_type<tc>, window_params = [{transform_indices = @transform_0, window_bounds = array<i64: 8, 384>}, {pipeline_mode = #tpu.pipeline_mode<synchronous>, transform_indices = @transform_1, window_bounds = array<i64: 1, 128>}, {pipeline_mode = #tpu.pipeline_mode<synchronous>, transform_indices = @transform_2, window_bounds = array<i64: 128, 384>}, {pipeline_mode = #tpu.pipeline_mode<synchronous>, transform_indices = @transform_3, window_bounds = array<i64: 1, 128>}, {transform_indices = @transform_4, window_bounds = array<i64: 8, 128>}]} {
    %c0_i32 = arith.constant 0 : i32
    %0 = arith.cmpi eq, %arg0, %c0_i32 : i32
    %1 = arith.extui %0 : i1 to i32
    %c0_i32_0 = arith.constant 0 : i32
    %2 = arith.cmpi ne, %1, %c0_i32_0 : i32
    scf.if %2 {
      %c0_40 = arith.constant 0 : index
      %c0_41 = arith.constant 0 : index
      %207 = vector.load %arg2[%c0_40, %c0_41] : memref<1x128xf32, #tpu.memory_space<vmem>>, vector<1x128xf32>
      %c0_42 = arith.constant 0 : index
      %c0_43 = arith.constant 0 : index
      %208 = vector.load %arg6[%c0_42, %c0_43] : memref<1x128xf32, #tpu.memory_space<vmem>>, vector<1x128xf32>
      tpu.vector_store %arg6[%c0_42, %c0_43], %207 {strides = array<i32>} : memref<1x128xf32, #tpu.memory_space<vmem>>, vector<1x128xf32>,
    } else {
    }
    %c0 = arith.constant 0 : index
    %c0_1 = arith.constant 0 : index
    %3 = vector.load %arg3[%c0, %c0_1] : memref<128x384xbf16, #tpu.memory_space<vmem>>, vector<128x384xbf16>
    %c0_2 = arith.constant 0 : index
    %c0_3 = arith.constant 0 : index
    %4 = vector.load %arg4[%c0_2, %c0_3] : memref<1x128xf32, #tpu.memory_space<vmem>>, vector<1x128xf32>
    %c0_4 = arith.constant 0 : index
    %c0_5 = arith.constant 0 : index
    %5 = vector.load %arg6[%c0_4, %c0_5] : memref<1x128xf32, #tpu.memory_space<vmem>>, vector<1x128xf32>
    %c0_i32_6 = arith.constant 0 : i32
    %6 = arith.index_cast %c0_i32_6 : i32 to index
    %c0_7 = arith.constant 0 : index
    %7 = vector.load %arg1[%6, %c0_7] : memref<8x384xf32, #tpu.memory_space<vmem>>, vector<1x384xf32>
    %8 = arith.truncf %5 : vector<1x128xf32> to vector<1x128xbf16>
    %cst = arith.constant dense<0.000000e+00> : vector<1x384xf32>
    %9 = tpu.matmul %8, %3, %cst {dimension_numbers = #tpu.dot_dimension_numbers<[1], [0], [0], [1], [0, 0, 1, 1], [], []>} : vector<1x128xbf16>, vector<128x384xbf16>, vector<1x384xf32> -> vector<1x384xf32>
    %10 = vector.extract_strided_slice %7 {offsets = [0, 0], sizes = [1, 256], strides = [1, 1]} : vector<1x384xf32> to vector<1x256xf32>
    %11 = vector.extract_strided_slice %9 {offsets = [0, 0], sizes = [1, 256], strides = [1, 1]} : vector<1x384xf32> to vector<1x256xf32>
    %12 = arith.addf %10, %11 : vector<1x256xf32>
    %13 = arith.negf %12 : vector<1x256xf32>
    %14 = math.exp %13 : vector<1x256xf32>
    %cst_8 = arith.constant 1.000000e+00 : f32
    %15 = vector.broadcast %cst_8 : f32 to vector<1x256xf32>
    %16 = arith.addf %15, %14 : vector<1x256xf32>
    %17 = arith.divf %15, %16 : vector<1x256xf32>
    %18 = vector.extract_strided_slice %17 {offsets = [0, 0], sizes = [1, 128], strides = [1, 1]} : vector<1x256xf32> to vector<1x128xf32>
    %19 = vector.extract_strided_slice %17 {offsets = [0, 128], sizes = [1, 128], strides = [1, 1]} : vector<1x256xf32> to vector<1x128xf32>
    %20 = vector.extract_strided_slice %7 {offsets = [0, 256], sizes = [1, 128], strides = [1, 1]} : vector<1x384xf32> to vector<1x128xf32>
    %21 = vector.extract_strided_slice %9 {offsets = [0, 256], sizes = [1, 128], strides = [1, 1]} : vector<1x384xf32> to vector<1x128xf32>
    %22 = arith.addf %21, %4 : vector<1x128xf32>
    %23 = arith.mulf %18, %22 : vector<1x128xf32>
    %24 = arith.addf %20, %23 : vector<1x128xf32>
    %25 = math.tanh %24 : vector<1x128xf32>
    %26 = arith.subf %5, %25 : vector<1x128xf32>
    %27 = arith.mulf %19, %26 : vector<1x128xf32>
    %28 = arith.addf %25, %27 : vector<1x128xf32>
    %29 = arith.index_cast %c0_i32_6 : i32 to index
    %c0_9 = arith.constant 0 : index
    %30 = vector.load %arg5[%29, %c0_9] : memref<8x128xf32, #tpu.memory_space<vmem>>, vector<1x128xf32>
    tpu.vector_store %arg5[%29, %c0_9], %28 {strides = array<i32>} : memref<8x128xf32, #tpu.memory_space<vmem>>, vector<1x128xf32>,
    %c1_i32 = arith.constant 1 : i32
    %31 = arith.index_cast %c1_i32 : i32 to index
    %c0_10 = arith.constant 0 : index
    %32 = vector.load %arg1[%31, %c0_10] : memref<8x384xf32, #tpu.memory_space<vmem>>, vector<1x384xf32>
    %33 = arith.truncf %28 : vector<1x128xf32> to vector<1x128xbf16>
    %cst_11 = arith.constant dense<0.000000e+00> : vector<1x384xf32>
    %34 = tpu.matmul %33, %3, %cst_11 {dimension_numbers = #tpu.dot_dimension_numbers<[1], [0], [0], [1], [0, 0, 1, 1], [], []>} : vector<1x128xbf16>, vector<128x384xbf16>, vector<1x384xf32> -> vector<1x384xf32>
    %35 = vector.extract_strided_slice %32 {offsets = [0, 0], sizes = [1, 256], strides = [1, 1]} : vector<1x384xf32> to vector<1x256xf32>
    %36 = vector.extract_strided_slice %34 {offsets = [0, 0], sizes = [1, 256], strides = [1, 1]} : vector<1x384xf32> to vector<1x256xf32>
    %37 = arith.addf %35, %36 : vector<1x256xf32>
    %38 = arith.negf %37 : vector<1x256xf32>
    %39 = math.exp %38 : vector<1x256xf32>
    %cst_12 = arith.constant 1.000000e+00 : f32
    %40 = vector.broadcast %cst_12 : f32 to vector<1x256xf32>
    %41 = arith.addf %40, %39 : vector<1x256xf32>
    %42 = arith.divf %40, %41 : vector<1x256xf32>
    %43 = vector.extract_strided_slice %42 {offsets = [0, 0], sizes = [1, 128], strides = [1, 1]} : vector<1x256xf32> to vector<1x128xf32>
    %44 = vector.extract_strided_slice %42 {offsets = [0, 128], sizes = [1, 128], strides = [1, 1]} : vector<1x256xf32> to vector<1x128xf32>
    %45 = vector.extract_strided_slice %32 {offsets = [0, 256], sizes = [1, 128], strides = [1, 1]} : vector<1x384xf32> to vector<1x128xf32>
    %46 = vector.extract_strided_slice %34 {offsets = [0, 256], sizes = [1, 128], strides = [1, 1]} : vector<1x384xf32> to vector<1x128xf32>
    %47 = arith.addf %46, %4 : vector<1x128xf32>
    %48 = arith.mulf %43, %47 : vector<1x128xf32>
    %49 = arith.addf %45, %48 : vector<1x128xf32>
    %50 = math.tanh %49 : vector<1x128xf32>
    %51 = arith.subf %28, %50 : vector<1x128xf32>
    %52 = arith.mulf %44, %51 : vector<1x128xf32>
    %53 = arith.addf %50, %52 : vector<1x128xf32>
    %54 = arith.index_cast %c1_i32 : i32 to index
    %c0_13 = arith.constant 0 : index
    %55 = vector.load %arg5[%54, %c0_13] : memref<8x128xf32, #tpu.memory_space<vmem>>, vector<1x128xf32>
    tpu.vector_store %arg5[%54, %c0_13], %53 {strides = array<i32>} : memref<8x128xf32, #tpu.memory_space<vmem>>, vector<1x128xf32>,
    %c2_i32 = arith.constant 2 : i32
    %56 = arith.index_cast %c2_i32 : i32 to index
    %c0_14 = arith.constant 0 : index
    %57 = vector.load %arg1[%56, %c0_14] : memref<8x384xf32, #tpu.memory_space<vmem>>, vector<1x384xf32>
    %58 = arith.truncf %53 : vector<1x128xf32> to vector<1x128xbf16>
    %cst_15 = arith.constant dense<0.000000e+00> : vector<1x384xf32>
    %59 = tpu.matmul %58, %3, %cst_15 {dimension_numbers = #tpu.dot_dimension_numbers<[1], [0], [0], [1], [0, 0, 1, 1], [], []>} : vector<1x128xbf16>, vector<128x384xbf16>, vector<1x384xf32> -> vector<1x384xf32>
    %60 = vector.extract_strided_slice %57 {offsets = [0, 0], sizes = [1, 256], strides = [1, 1]} : vector<1x384xf32> to vector<1x256xf32>
    %61 = vector.extract_strided_slice %59 {offsets = [0, 0], sizes = [1, 256], strides = [1, 1]} : vector<1x384xf32> to vector<1x256xf32>
    %62 = arith.addf %60, %61 : vector<1x256xf32>
    %63 = arith.negf %62 : vector<1x256xf32>
    %64 = math.exp %63 : vector<1x256xf32>
    %cst_16 = arith.constant 1.000000e+00 : f32
    %65 = vector.broadcast %cst_16 : f32 to vector<1x256xf32>
    %66 = arith.addf %65, %64 : vector<1x256xf32>
    %67 = arith.divf %65, %66 : vector<1x256xf32>
    %68 = vector.extract_strided_slice %67 {offsets = [0, 0], sizes = [1, 128], strides = [1, 1]} : vector<1x256xf32> to vector<1x128xf32>
    %69 = vector.extract_strided_slice %67 {offsets = [0, 128], sizes = [1, 128], strides = [1, 1]} : vector<1x256xf32> to vector<1x128xf32>
    %70 = vector.extract_strided_slice %57 {offsets = [0, 256], sizes = [1, 128], strides = [1, 1]} : vector<1x384xf32> to vector<1x128xf32>
    %71 = vector.extract_strided_slice %59 {offsets = [0, 256], sizes = [1, 128], strides = [1, 1]} : vector<1x384xf32> to vector<1x128xf32>
    %72 = arith.addf %71, %4 : vector<1x128xf32>
    %73 = arith.mulf %68, %72 : vector<1x128xf32>
    %74 = arith.addf %70, %73 : vector<1x128xf32>
    %75 = math.tanh %74 : vector<1x128xf32>
    %76 = arith.subf %53, %75 : vector<1x128xf32>
    %77 = arith.mulf %69, %76 : vector<1x128xf32>
    %78 = arith.addf %75, %77 : vector<1x128xf32>
    %79 = arith.index_cast %c2_i32 : i32 to index
    %c0_17 = arith.constant 0 : index
    %80 = vector.load %arg5[%79, %c0_17] : memref<8x128xf32, #tpu.memory_space<vmem>>, vector<1x128xf32>
    tpu.vector_store %arg5[%79, %c0_17], %78 {strides = array<i32>} : memref<8x128xf32, #tpu.memory_space<vmem>>, vector<1x128xf32>,
    %c3_i32 = arith.constant 3 : i32
    %81 = arith.index_cast %c3_i32 : i32 to index
    %c0_18 = arith.constant 0 : index
    %82 = vector.load %arg1[%81, %c0_18] : memref<8x384xf32, #tpu.memory_space<vmem>>, vector<1x384xf32>
    %83 = arith.truncf %78 : vector<1x128xf32> to vector<1x128xbf16>
    %cst_19 = arith.constant dense<0.000000e+00> : vector<1x384xf32>
    %84 = tpu.matmul %83, %3, %cst_19 {dimension_numbers = #tpu.dot_dimension_numbers<[1], [0], [0], [1], [0, 0, 1, 1], [], []>} : vector<1x128xbf16>, vector<128x384xbf16>, vector<1x384xf32> -> vector<1x384xf32>
    %85 = vector.extract_strided_slice %82 {offsets = [0, 0], sizes = [1, 256], strides = [1, 1]} : vector<1x384xf32> to vector<1x256xf32>
    %86 = vector.extract_strided_slice %84 {offsets = [0, 0], sizes = [1, 256], strides = [1, 1]} : vector<1x384xf32> to vector<1x256xf32>
    %87 = arith.addf %85, %86 : vector<1x256xf32>
    %88 = arith.negf %87 : vector<1x256xf32>
    %89 = math.exp %88 : vector<1x256xf32>
    %cst_20 = arith.constant 1.000000e+00 : f32
    %90 = vector.broadcast %cst_20 : f32 to vector<1x256xf32>
    %91 = arith.addf %90, %89 : vector<1x256xf32>
    %92 = arith.divf %90, %91 : vector<1x256xf32>
    %93 = vector.extract_strided_slice %92 {offsets = [0, 0], sizes = [1, 128], strides = [1, 1]} : vector<1x256xf32> to vector<1x128xf32>
    %94 = vector.extract_strided_slice %92 {offsets = [0, 128], sizes = [1, 128], strides = [1, 1]} : vector<1x256xf32> to vector<1x128xf32>
    %95 = vector.extract_strided_slice %82 {offsets = [0, 256], sizes = [1, 128], strides = [1, 1]} : vector<1x384xf32> to vector<1x128xf32>
    %96 = vector.extract_strided_slice %84 {offsets = [0, 256], sizes = [1, 128], strides = [1, 1]} : vector<1x384xf32> to vector<1x128xf32>
    %97 = arith.addf %96, %4 : vector<1x128xf32>
    %98 = arith.mulf %93, %97 : vector<1x128xf32>
    %99 = arith.addf %95, %98 : vector<1x128xf32>
    %100 = math.tanh %99 : vector<1x128xf32>
    %101 = arith.subf %78, %100 : vector<1x128xf32>
    %102 = arith.mulf %94, %101 : vector<1x128xf32>
    %103 = arith.addf %100, %102 : vector<1x128xf32>
    %104 = arith.index_cast %c3_i32 : i32 to index
    %c0_21 = arith.constant 0 : index
    %105 = vector.load %arg5[%104, %c0_21] : memref<8x128xf32, #tpu.memory_space<vmem>>, vector<1x128xf32>
    tpu.vector_store %arg5[%104, %c0_21], %103 {strides = array<i32>} : memref<8x128xf32, #tpu.memory_space<vmem>>, vector<1x128xf32>,
    %c4_i32 = arith.constant 4 : i32
    %106 = arith.index_cast %c4_i32 : i32 to index
    %c0_22 = arith.constant 0 : index
    %107 = vector.load %arg1[%106, %c0_22] : memref<8x384xf32, #tpu.memory_space<vmem>>, vector<1x384xf32>
    %108 = arith.truncf %103 : vector<1x128xf32> to vector<1x128xbf16>
    %cst_23 = arith.constant dense<0.000000e+00> : vector<1x384xf32>
    %109 = tpu.matmul %108, %3, %cst_23 {dimension_numbers = #tpu.dot_dimension_numbers<[1], [0], [0], [1], [0, 0, 1, 1], [], []>} : vector<1x128xbf16>, vector<128x384xbf16>, vector<1x384xf32> -> vector<1x384xf32>
    %110 = vector.extract_strided_slice %107 {offsets = [0, 0], sizes = [1, 256], strides = [1, 1]} : vector<1x384xf32> to vector<1x256xf32>
    %111 = vector.extract_strided_slice %109 {offsets = [0, 0], sizes = [1, 256], strides = [1, 1]} : vector<1x384xf32> to vector<1x256xf32>
    %112 = arith.addf %110, %111 : vector<1x256xf32>
    %113 = arith.negf %112 : vector<1x256xf32>
    %114 = math.exp %113 : vector<1x256xf32>
    %cst_24 = arith.constant 1.000000e+00 : f32
    %115 = vector.broadcast %cst_24 : f32 to vector<1x256xf32>
    %116 = arith.addf %115, %114 : vector<1x256xf32>
    %117 = arith.divf %115, %116 : vector<1x256xf32>
    %118 = vector.extract_strided_slice %117 {offsets = [0, 0], sizes = [1, 128], strides = [1, 1]} : vector<1x256xf32> to vector<1x128xf32>
    %119 = vector.extract_strided_slice %117 {offsets = [0, 128], sizes = [1, 128], strides = [1, 1]} : vector<1x256xf32> to vector<1x128xf32>
    %120 = vector.extract_strided_slice %107 {offsets = [0, 256], sizes = [1, 128], strides = [1, 1]} : vector<1x384xf32> to vector<1x128xf32>
    %121 = vector.extract_strided_slice %109 {offsets = [0, 256], sizes = [1, 128], strides = [1, 1]} : vector<1x384xf32> to vector<1x128xf32>
    %122 = arith.addf %121, %4 : vector<1x128xf32>
    %123 = arith.mulf %118, %122 : vector<1x128xf32>
    %124 = arith.addf %120, %123 : vector<1x128xf32>
    %125 = math.tanh %124 : vector<1x128xf32>
    %126 = arith.subf %103, %125 : vector<1x128xf32>
    %127 = arith.mulf %119, %126 : vector<1x128xf32>
    %128 = arith.addf %125, %127 : vector<1x128xf32>
    %129 = arith.index_cast %c4_i32 : i32 to index
    %c0_25 = arith.constant 0 : index
    %130 = vector.load %arg5[%129, %c0_25] : memref<8x128xf32, #tpu.memory_space<vmem>>, vector<1x128xf32>
    tpu.vector_store %arg5[%129, %c0_25], %128 {strides = array<i32>} : memref<8x128xf32, #tpu.memory_space<vmem>>, vector<1x128xf32>,
    %c5_i32 = arith.constant 5 : i32
    %131 = arith.index_cast %c5_i32 : i32 to index
    %c0_26 = arith.constant 0 : index
    %132 = vector.load %arg1[%131, %c0_26] : memref<8x384xf32, #tpu.memory_space<vmem>>, vector<1x384xf32>
    %133 = arith.truncf %128 : vector<1x128xf32> to vector<1x128xbf16>
    %cst_27 = arith.constant dense<0.000000e+00> : vector<1x384xf32>
    %134 = tpu.matmul %133, %3, %cst_27 {dimension_numbers = #tpu.dot_dimension_numbers<[1], [0], [0], [1], [0, 0, 1, 1], [], []>} : vector<1x128xbf16>, vector<128x384xbf16>, vector<1x384xf32> -> vector<1x384xf32>
    %135 = vector.extract_strided_slice %132 {offsets = [0, 0], sizes = [1, 256], strides = [1, 1]} : vector<1x384xf32> to vector<1x256xf32>
    %136 = vector.extract_strided_slice %134 {offsets = [0, 0], sizes = [1, 256], strides = [1, 1]} : vector<1x384xf32> to vector<1x256xf32>
    %137 = arith.addf %135, %136 : vector<1x256xf32>
    %138 = arith.negf %137 : vector<1x256xf32>
    %139 = math.exp %138 : vector<1x256xf32>
    %cst_28 = arith.constant 1.000000e+00 : f32
    %140 = vector.broadcast %cst_28 : f32 to vector<1x256xf32>
    %141 = arith.addf %140, %139 : vector<1x256xf32>
    %142 = arith.divf %140, %141 : vector<1x256xf32>
    %143 = vector.extract_strided_slice %142 {offsets = [0, 0], sizes = [1, 128], strides = [1, 1]} : vector<1x256xf32> to vector<1x128xf32>
    %144 = vector.extract_strided_slice %142 {offsets = [0, 128], sizes = [1, 128], strides = [1, 1]} : vector<1x256xf32> to vector<1x128xf32>
    %145 = vector.extract_strided_slice %132 {offsets = [0, 256], sizes = [1, 128], strides = [1, 1]} : vector<1x384xf32> to vector<1x128xf32>
    %146 = vector.extract_strided_slice %134 {offsets = [0, 256], sizes = [1, 128], strides = [1, 1]} : vector<1x384xf32> to vector<1x128xf32>
    %147 = arith.addf %146, %4 : vector<1x128xf32>
    %148 = arith.mulf %143, %147 : vector<1x128xf32>
    %149 = arith.addf %145, %148 : vector<1x128xf32>
    %150 = math.tanh %149 : vector<1x128xf32>
    %151 = arith.subf %128, %150 : vector<1x128xf32>
    %152 = arith.mulf %144, %151 : vector<1x128xf32>
    %153 = arith.addf %150, %152 : vector<1x128xf32>
    %154 = arith.index_cast %c5_i32 : i32 to index
    %c0_29 = arith.constant 0 : index
    %155 = vector.load %arg5[%154, %c0_29] : memref<8x128xf32, #tpu.memory_space<vmem>>, vector<1x128xf32>
    tpu.vector_store %arg5[%154, %c0_29], %153 {strides = array<i32>} : memref<8x128xf32, #tpu.memory_space<vmem>>, vector<1x128xf32>,
    %c6_i32 = arith.constant 6 : i32
    %156 = arith.index_cast %c6_i32 : i32 to index
    %c0_30 = arith.constant 0 : index
    %157 = vector.load %arg1[%156, %c0_30] : memref<8x384xf32, #tpu.memory_space<vmem>>, vector<1x384xf32>
    %158 = arith.truncf %153 : vector<1x128xf32> to vector<1x128xbf16>
    %cst_31 = arith.constant dense<0.000000e+00> : vector<1x384xf32>
    %159 = tpu.matmul %158, %3, %cst_31 {dimension_numbers = #tpu.dot_dimension_numbers<[1], [0], [0], [1], [0, 0, 1, 1], [], []>} : vector<1x128xbf16>, vector<128x384xbf16>, vector<1x384xf32> -> vector<1x384xf32>
    %160 = vector.extract_strided_slice %157 {offsets = [0, 0], sizes = [1, 256], strides = [1, 1]} : vector<1x384xf32> to vector<1x256xf32>
    %161 = vector.extract_strided_slice %159 {offsets = [0, 0], sizes = [1, 256], strides = [1, 1]} : vector<1x384xf32> to vector<1x256xf32>
    %162 = arith.addf %160, %161 : vector<1x256xf32>
    %163 = arith.negf %162 : vector<1x256xf32>
    %164 = math.exp %163 : vector<1x256xf32>
    %cst_32 = arith.constant 1.000000e+00 : f32
    %165 = vector.broadcast %cst_32 : f32 to vector<1x256xf32>
    %166 = arith.addf %165, %164 : vector<1x256xf32>
    %167 = arith.divf %165, %166 : vector<1x256xf32>
    %168 = vector.extract_strided_slice %167 {offsets = [0, 0], sizes = [1, 128], strides = [1, 1]} : vector<1x256xf32> to vector<1x128xf32>
    %169 = vector.extract_strided_slice %167 {offsets = [0, 128], sizes = [1, 128], strides = [1, 1]} : vector<1x256xf32> to vector<1x128xf32>
    %170 = vector.extract_strided_slice %157 {offsets = [0, 256], sizes = [1, 128], strides = [1, 1]} : vector<1x384xf32> to vector<1x128xf32>
    %171 = vector.extract_strided_slice %159 {offsets = [0, 256], sizes = [1, 128], strides = [1, 1]} : vector<1x384xf32> to vector<1x128xf32>
    %172 = arith.addf %171, %4 : vector<1x128xf32>
    %173 = arith.mulf %168, %172 : vector<1x128xf32>
    %174 = arith.addf %170, %173 : vector<1x128xf32>
    %175 = math.tanh %174 : vector<1x128xf32>
    %176 = arith.subf %153, %175 : vector<1x128xf32>
    %177 = arith.mulf %169, %176 : vector<1x128xf32>
    %178 = arith.addf %175, %177 : vector<1x128xf32>
    %179 = arith.index_cast %c6_i32 : i32 to index
    %c0_33 = arith.constant 0 : index
    %180 = vector.load %arg5[%179, %c0_33] : memref<8x128xf32, #tpu.memory_space<vmem>>, vector<1x128xf32>
    tpu.vector_store %arg5[%179, %c0_33], %178 {strides = array<i32>} : memref<8x128xf32, #tpu.memory_space<vmem>>, vector<1x128xf32>,
    %c7_i32 = arith.constant 7 : i32
    %181 = arith.index_cast %c7_i32 : i32 to index
    %c0_34 = arith.constant 0 : index
    %182 = vector.load %arg1[%181, %c0_34] : memref<8x384xf32, #tpu.memory_space<vmem>>, vector<1x384xf32>
    %183 = arith.truncf %178 : vector<1x128xf32> to vector<1x128xbf16>
    %cst_35 = arith.constant dense<0.000000e+00> : vector<1x384xf32>
    %184 = tpu.matmul %183, %3, %cst_35 {dimension_numbers = #tpu.dot_dimension_numbers<[1], [0], [0], [1], [0, 0, 1, 1], [], []>} : vector<1x128xbf16>, vector<128x384xbf16>, vector<1x384xf32> -> vector<1x384xf32>
    %185 = vector.extract_strided_slice %182 {offsets = [0, 0], sizes = [1, 256], strides = [1, 1]} : vector<1x384xf32> to vector<1x256xf32>
    %186 = vector.extract_strided_slice %184 {offsets = [0, 0], sizes = [1, 256], strides = [1, 1]} : vector<1x384xf32> to vector<1x256xf32>
    %187 = arith.addf %185, %186 : vector<1x256xf32>
    %188 = arith.negf %187 : vector<1x256xf32>
    %189 = math.exp %188 : vector<1x256xf32>
    %cst_36 = arith.constant 1.000000e+00 : f32
    %190 = vector.broadcast %cst_36 : f32 to vector<1x256xf32>
    %191 = arith.addf %190, %189 : vector<1x256xf32>
    %192 = arith.divf %190, %191 : vector<1x256xf32>
    %193 = vector.extract_strided_slice %192 {offsets = [0, 0], sizes = [1, 128], strides = [1, 1]} : vector<1x256xf32> to vector<1x128xf32>
    %194 = vector.extract_strided_slice %192 {offsets = [0, 128], sizes = [1, 128], strides = [1, 1]} : vector<1x256xf32> to vector<1x128xf32>
    %195 = vector.extract_strided_slice %182 {offsets = [0, 256], sizes = [1, 128], strides = [1, 1]} : vector<1x384xf32> to vector<1x128xf32>
    %196 = vector.extract_strided_slice %184 {offsets = [0, 256], sizes = [1, 128], strides = [1, 1]} : vector<1x384xf32> to vector<1x128xf32>
    %197 = arith.addf %196, %4 : vector<1x128xf32>
    %198 = arith.mulf %193, %197 : vector<1x128xf32>
    %199 = arith.addf %195, %198 : vector<1x128xf32>
    %200 = math.tanh %199 : vector<1x128xf32>
    %201 = arith.subf %178, %200 : vector<1x128xf32>
    %202 = arith.mulf %194, %201 : vector<1x128xf32>
    %203 = arith.addf %200, %202 : vector<1x128xf32>
    %204 = arith.index_cast %c7_i32 : i32 to index
    %c0_37 = arith.constant 0 : index
    %205 = vector.load %arg5[%204, %c0_37] : memref<8x128xf32, #tpu.memory_space<vmem>>, vector<1x128xf32>
    tpu.vector_store %arg5[%204, %c0_37], %203 {strides = array<i32>} : memref<8x128xf32, #tpu.memory_space<vmem>>, vector<1x128xf32>,
    %c8_i32 = arith.constant 8 : i32
    %c0_38 = arith.constant 0 : index
    %c0_39 = arith.constant 0 : index
    %206 = vector.load %arg6[%c0_38, %c0_39] : memref<1x128xf32, #tpu.memory_space<vmem>>, vector<1x128xf32>
    tpu.vector_store %arg6[%c0_38, %c0_39], %203 {strides = array<i32>} : memref<1x128xf32, #tpu.memory_space<vmem>>, vector<1x128xf32>,
    return
  }
  func.func @transform_0(%arg0: i32) -> (i32, i32) {
    %c0_i32 = arith.constant 0 : i32
    %c0_i32_0 = arith.constant 0 : i32
    return %arg0, %c0_i32 : i32, i32
  }
  func.func @transform_1(%arg0: i32) -> (i32, i32) {
    %c0_i32 = arith.constant 0 : i32
    %c0_i32_0 = arith.constant 0 : i32
    %c0_i32_1 = arith.constant 0 : i32
    return %c0_i32, %c0_i32_0 : i32, i32
  }
  func.func @transform_2(%arg0: i32) -> (i32, i32) {
    %c0_i32 = arith.constant 0 : i32
    %c0_i32_0 = arith.constant 0 : i32
    %c0_i32_1 = arith.constant 0 : i32
    return %c0_i32, %c0_i32_0 : i32, i32
  }
  func.func @transform_3(%arg0: i32) -> (i32, i32) {
    %c0_i32 = arith.constant 0 : i32
    %c0_i32_0 = arith.constant 0 : i32
    %c0_i32_1 = arith.constant 0 : i32
    return %c0_i32, %c0_i32_0 : i32, i32
  }
  func.func @transform_4(%arg0: i32) -> (i32, i32) {
    %c0_i32 = arith.constant 0 : i32
    %c0_i32_0 = arith.constant 0 : i32
    return %arg0, %c0_i32 : i32, i32
  }
}

</mosaic_0001>

<bundles_post_ra>
// kernel: gru_sequence.1
= control target key start
LH: loop header
LB: loop body
LE: loop exit
PB: predicated region body
PF: predicated region fallthrough
CT: control target
= control target key end

     0   :  { %s1551_s0 = inlined_call_operand.vmem [shape: f32[8,384], index: 0, kind: input, shape index: {}]   ;;  %s1552_s1 = inlined_call_operand.vmem [shape: f32[1,128], index: 1, kind: input, shape index: {}]   ;;  %s1553_s2 = inlined_call_operand.vmem [shape: bf16[128,384], index: 2, kind: input, shape index: {}]   ;;  %s1554_s3 = inlined_call_operand.vmem [shape: f32[1,128], index: 3, kind: input, shape index: {}]   ;;  %s1555_s4 = inlined_call_operand.hbm [shape: f32[8,128], index: 4, kind: output, shape index: {}]  }
   0x1   :  { %v937_v0 = vld [vmem:[%s1553_s2 + $0xa8] sm:$0xf]  ;;  %v984_v1 = vld [vmem:[%s1553_s2 + $0xb0] sm:$0xf0]  ;;  %v983_v2 = vld [vmem:[%s1553_s2 + $0xac] sm:$0xf] }
   0x2   :  { %v1096_v3 = vor.u32 %v984_v1, %v937_v0  ;;  %v939_v4 = vld [vmem:[%s1553_s2 + $0xb4] sm:$0xf0]  ;;  %v925_v5 = vld [vmem:[%s1553_s2 + $0x90] sm:$0xf]  ;;  %v981_v6 = vld [vmem:[%s1553_s2 + $0x98] sm:$0xf0] }
   0x3   :  { %v1107_v7 = vor.u32 %v983_v2, %v939_v4  ;;  %v980_v8 = vld [vmem:[%s1553_s2 + $0x94] sm:$0xf]  ;;  %v927_v9 = vld [vmem:[%s1553_s2 + $0x9c] sm:$0xf0]  ;;  %v1116_v10 = vor.u32 %v981_v6, %v925_v5  ;;  %v913_v12 = vld [vmem:[%s1553_s2 + $0x78] sm:$0xf] }
   0x4   :  { %188 = vmatpush.bf16.msra.mxu0 %v1096_v3  ;;  %270 = vmatpush.bf16.msra.mxu3 %v1096_v3  ;;  %v1120_v11 = vor.u32 %v980_v8, %v927_v9  ;;  %v978_v13 = vld [vmem:[%s1553_s2 + $0x80] sm:$0xf0]  ;;  %v977_v14 = vld [vmem:[%s1553_s2 + $0x7c] sm:$0xf]  ;;  %v915_v15 = vld [vmem:[%s1553_s2 + $0x84] sm:$0xf0] }
   0x5   :  { %201 = vmatpush.bf16.msra.mxu1 %v1107_v7  ;;  %v945_v16 = vld [vmem:[%s1553_s2 + $0xb0] sm:$0xf]  ;;  %v1138_v17 = vor.u32 %v978_v13, %v913_v12  ;;  %v985_v18 = vld [vmem:[%s1553_s2 + $0xb8] sm:$0xf0]  ;;  %v1145_v19 = vor.u32 %v977_v14, %v915_v15  ;;  %v901_v20 = vld [vmem:[%s1553_s2 + $0x60] sm:$0xf] }
   0x6   :  { %v975_v21 = vld [vmem:[%s1553_s2 + $0x68] sm:$0xf0]  ;;  %v1153_v22 = vor.u32 %v985_v18, %v945_v16  ;;  %v933_v23 = vld [vmem:[%s1553_s2 + $0x98] sm:$0xf]  ;;  %v974_v24 = vld [vmem:[%s1553_s2 + $0x64] sm:$0xf] }
   0x7   :  { %v903_v25 = vld [vmem:[%s1553_s2 + $0x6c] sm:$0xf0]  ;;  %v982_v26 = vld [vmem:[%s1553_s2 + $0xa0] sm:$0xf0]  ;;  %v1171_v28 = vor.u32 %v975_v21, %v901_v20  ;;  %v921_v29 = vld [vmem:[%s1553_s2 + $0x80] sm:$0xf] }
   0x8   :  { %189 = vmatpush.bf16.msra.mxu0 %v1116_v10  ;;  %271 = vmatpush.bf16.msra.mxu3 %v1116_v10  ;;  %v1168_v27 = vor.u32 %v982_v26, %v933_v23  ;;  %v979_v30 = vld [vmem:[%s1553_s2 + $0x88] sm:$0xf0]  ;;  %v1181_v31 = vor.u32 %v974_v24, %v903_v25  ;;  %v889_v32 = vld [vmem:[%s1553_s2 + $0x48] sm:$0xf]  ;;  %v972_v33 = vld [vmem:[%s1553_s2 + $0x50] sm:$0xf0] }
   0x9   :  { %202 = vmatpush.bf16.msra.mxu1 %v1120_v11  ;;  %214 = vmatpush.bf16.msra.mxu2 %v1153_v22  ;;  %v971_v34 = vld [vmem:[%s1553_s2 + $0x4c] sm:$0xf]  ;;  %v891_v35 = vld [vmem:[%s1553_s2 + $0x54] sm:$0xf0]  ;;  %v22_v36 = vld [vmem:[%s1552_s1] sm:$0x1]  ;;  %v1199_v37 = vor.u32 %v979_v30, %v921_v29  ;;  %v1202_v38 = vor.u32 %v972_v33, %v889_v32 }
   0xa   :  { %23 = vst [vmem:[#allocation2] sm:$0x1] %v22_v36  ;;  %v909_v39 = vld [vmem:[%s1553_s2 + $0x68] sm:$0xf]  ;;  %v976_v40 = vld [vmem:[%s1553_s2 + $0x70] sm:$0xf0]  ;;  %v1212_v41 = vor.u32 %v971_v34, %v891_v35 }
   0xb   :  { %v877_v42 = vld [vmem:[%s1553_s2 + $0x30] sm:$0xf]  ;;  %v969_v43 = vld [vmem:[%s1553_s2 + $0x38] sm:$0xf0] }
   0xc   :  { %190 = vmatpush.bf16.msra.mxu0 %v1138_v17  ;;  %272 = vmatpush.bf16.msra.mxu3 %v1138_v17 }
   0xd   :  { %203 = vmatpush.bf16.msra.mxu1 %v1145_v19  ;;  %215 = vmatpush.bf16.msra.mxu2 %v1168_v27 }
  0x10   :  { %191 = vmatpush.bf16.msra.mxu0 %v1171_v28  ;;  %273 = vmatpush.bf16.msra.mxu3 %v1171_v28 }
  0x11   :  { %204 = vmatpush.bf16.msra.mxu1 %v1181_v31 }
  0x12   :  { %9 = vsyncpa [#allocation4], 0  ;;  %v968_v44 = vld [vmem:[%s1553_s2 + $0x34] sm:$0xf]  ;;  %v879_v45 = vld [vmem:[%s1553_s2 + $0x3c] sm:$0xf0]  ;;  %216 = vmatpush.bf16.msra.mxu2 %v1199_v37  ;;  %v1227_v46 = vor.u32 %v976_v40, %v909_v39  ;;  %v1230_v47 = vor.u32 %v969_v43, %v877_v42 }
  0x13   :  { %v897_v48 = vld [vmem:[%s1553_s2 + $0x50] sm:$0xf]  ;;  %v973_v49 = vld [vmem:[%s1553_s2 + $0x58] sm:$0xf0]  ;;  %v1240_v50 = vor.u32 %v968_v44, %v879_v45  ;;  %v865_v51 = vld [vmem:[%s1553_s2 + $0x18] sm:$0xf] }
  0x14   :  { %192 = vmatpush.bf16.msra.mxu0 %v1202_v38  ;;  %274 = vmatpush.bf16.msra.mxu3 %v1202_v38  ;;  %v966_v52 = vld [vmem:[%s1553_s2 + $0x20] sm:$0xf0]  ;;  %v965_v53 = vld [vmem:[%s1553_s2 + $0x1c] sm:$0xf]  ;;  %v867_v54 = vld [vmem:[%s1553_s2 + $0x24] sm:$0xf0]  ;;  %v1255_v55 = vor.u32 %v973_v49, %v897_v48 }
  0x15   :  { %205 = vmatpush.bf16.msra.mxu1 %v1212_v41  ;;  %v1258_v56 = vor.u32 %v966_v52, %v865_v51  ;;  %v885_v57 = vld [vmem:[%s1553_s2 + $0x38] sm:$0xf]  ;;  %v970_v58 = vld [vmem:[%s1553_s2 + $0x40] sm:$0xf0]  ;;  %v1268_v59 = vor.u32 %v965_v53, %v867_v54  ;;  %v853_v60 = vld [vmem:[%s1553_s2] sm:$0xf] }
  0x16   :  { %217 = vmatpush.bf16.msra.mxu2 %v1227_v46  ;;  %v963_v61 = vld [vmem:[%s1553_s2 + $0x8] sm:$0xf0]  ;;  %v962_v62 = vld [vmem:[%s1553_s2 + $0x4] sm:$0xf]  ;;  %v855_v63 = vld [vmem:[%s1553_s2 + $0xc] sm:$0xf0]  ;;  %v1283_v0 = vor.u32 %v970_v58, %v885_v57 }
  0x17   :  { %v1286_v1 = vor.u32 %v963_v61, %v853_v60  ;;  %v1288_v2 = vld [vmem:[#allocation2] sm:$0x1]  ;;  %v967_v5 = vld [vmem:[%s1553_s2 + $0x28] sm:$0xf0]  ;;  %v1298_v6 = vor.u32 %v962_v62, %v855_v63  ;;  %v861_v12 = vld [vmem:[%s1553_s2 + $0x8] sm:$0xf] }
  0x18   :  { %193 = vmatpush.bf16.msra.mxu0 %v1230_v47  ;;  %275 = vmatpush.bf16.msra.mxu3 %v1230_v47  ;;  %v873_v4 = vld [vmem:[%s1553_s2 + $0x20] sm:$0xf]  ;;  %v59_v8 = vpack.c.bf16 %v1288_v2, %v1288_v2  ;;  %v964_v13 = vld [vmem:[%s1553_s2 + $0x10] sm:$0xf0]  ;;  %vm230_vm0 = vcmask 1040384   ;;  %s842_s25 = sshll.u32 %s1555_s4, 4  ;;  %s843_s25 = int_to_ptr.hbm [resolvable:$true] %s842_s25 }
  0x19   :  { %206 = vmatpush.bf16.msra.mxu1 %v1240_v50  ;;  %v1303_v9 = vor.u32 %v967_v5, %v873_v4  ;;  %v1318_v14 = vor.u32 %v964_v13, %v861_v12  ;;  %v58_v18 = vld [vmem:[%s1551_s0] ss:$8 sm:$0x7] }
  0x1a   :  { %218 = vmatpush.bf16.msra.mxu2 %v1255_v55  ;;  %v1381_v39 = vld [vmem:[%s1554_s3] sm:$0x1]  ;;  %v256_v51 = vrot.slane %v58_v18, 2 }
  0x1c   :  { %194 = vmatpush.bf16.msra.mxu0 %v1258_v56  ;;  %276 = vmatpush.bf16.msra.mxu3 %v1258_v56 }
  0x1d   :  { %207 = vmatpush.bf16.msra.mxu1 %v1268_v59 }
  0x1e   :  { %219 = vmatpush.bf16.msra.mxu2 %v1283_v0 }
  0x20   :  { %195 = vmatpush.bf16.msra.mxu0 %v1286_v1  ;;  %277 = vmatpush.bf16.msra.mxu3 %v1286_v1 }
  0x21   :  { %208 = vmatpush.bf16.msra.mxu1 %v1298_v6 }
  0x22   :  { %220 = vmatpush.bf16.msra.mxu2 %v1303_v9 }
  0x23   :  { %196 = vmatmul.bf16.vlgmr.msra.gmra.mxu0 %v59_v8 }
  0x24   :  { %283 = vmatpush.bf16.msrb.mxu0 %v1107_v7  ;;  %364 = vmatpush.bf16.msrb.mxu3 %v1107_v7 }
  0x25   :  { %296 = vmatpush.bf16.msrb.mxu1 %v1153_v22 }
  0x26   :  { %209 = vmatmul.bf16.vlgmr.msra.gmra.mxu1 %v59_v8  ;;  %221 = vmatpush.bf16.msra.mxu2 %v1318_v14 }
  0x28   :  { %284 = vmatpush.bf16.msrb.mxu0 %v1120_v11  ;;  %365 = vmatpush.bf16.msrb.mxu3 %v1120_v11 }
  0x29   :  { %297 = vmatpush.bf16.msrb.mxu1 %v1168_v27  ;;  %222 = vmatmul.bf16.vlgmr.msra.gmra.mxu2 %v59_v8  ;;  %v948_v8 = vld [vmem:[%s1551_s0 + $0x1] ss:$8 sm:$0x7] }
  0x2a   :  { %351 = vmatpush.bf16.msrb.mxu2 %v1096_v3 }
  0x2c   :  { %285 = vmatpush.bf16.msrb.mxu0 %v1145_v19  ;;  %366 = vmatpush.bf16.msrb.mxu3 %v1145_v19 }
  0x2d   :  { %298 = vmatpush.bf16.msrb.mxu1 %v1199_v37 }
  0x2e   :  { %352 = vmatpush.bf16.msrb.mxu2 %v1116_v10 }
  0x30   :  { %286 = vmatpush.bf16.msrb.mxu0 %v1181_v31  ;;  %367 = vmatpush.bf16.msrb.mxu3 %v1181_v31 }
  0x31   :  { %299 = vmatpush.bf16.msrb.mxu1 %v1227_v46 }
  0x32   :  { %353 = vmatpush.bf16.msrb.mxu2 %v1138_v17 }
  0x34   :  { %287 = vmatpush.bf16.msrb.mxu0 %v1212_v41  ;;  %368 = vmatpush.bf16.msrb.mxu3 %v1212_v41 }
  0x35   :  { %300 = vmatpush.bf16.msrb.mxu1 %v1255_v55 }
  0x36   :  { %354 = vmatpush.bf16.msrb.mxu2 %v1171_v28 }
  0x38   :  { %288 = vmatpush.bf16.msrb.mxu0 %v1240_v50  ;;  %369 = vmatpush.bf16.msrb.mxu3 %v1240_v50 }
  0x39   :  { %301 = vmatpush.bf16.msrb.mxu1 %v1283_v0 }
  0x3a   :  { %355 = vmatpush.bf16.msrb.mxu2 %v1202_v38 }
  0x3c   :  { %289 = vmatpush.bf16.msrb.mxu0 %v1268_v59  ;;  %370 = vmatpush.bf16.msrb.mxu3 %v1268_v59 }
  0x3d   :  { %302 = vmatpush.bf16.msrb.mxu1 %v1303_v9 }
  0x3e   :  { %356 = vmatpush.bf16.msrb.mxu2 %v1230_v47 }
  0x40   :  { %290 = vmatpush.bf16.msrb.mxu0 %v1298_v6  ;;  %371 = vmatpush.bf16.msrb.mxu3 %v1298_v6 }
  0x41   :  { %303 = vmatpush.bf16.msrb.mxu1 %v1318_v14 }
  0x42   :  { %357 = vmatpush.bf16.msrb.mxu2 %v1258_v56 }
  0x44   :  { %377 = vmatpush.bf16.msra.mxu0 %v1153_v22 }
  0x45   :  { %432 = vmatpush.bf16.msra.mxu1 %v1096_v3 }
  0x46   :  { %358 = vmatpush.bf16.msrb.mxu2 %v1286_v1 }
  0x48   :  { %378 = vmatpush.bf16.msra.mxu0 %v1168_v27 }
  0x49   :  { %433 = vmatpush.bf16.msra.mxu1 %v1116_v10 }
  0x4a   :  { %445 = vmatpush.bf16.msra.mxu2 %v1107_v7 }
  0x4c   :  { %379 = vmatpush.bf16.msra.mxu0 %v1199_v37 }
  0x4d   :  { %434 = vmatpush.bf16.msra.mxu1 %v1138_v17 }
  0x4e   :  { %446 = vmatpush.bf16.msra.mxu2 %v1120_v11 }
  0x50   :  { %380 = vmatpush.bf16.msra.mxu0 %v1227_v46 }
  0x51   :  { %435 = vmatpush.bf16.msra.mxu1 %v1171_v28 }
  0x52   :  { %447 = vmatpush.bf16.msra.mxu2 %v1145_v19 }
  0x54   :  { %381 = vmatpush.bf16.msra.mxu0 %v1255_v55 }
  0x55   :  { %436 = vmatpush.bf16.msra.mxu1 %v1202_v38 }
  0x56   :  { %448 = vmatpush.bf16.msra.mxu2 %v1181_v31 }
  0x58   :  { %382 = vmatpush.bf16.msra.mxu0 %v1283_v0 }
  0x59   :  { %437 = vmatpush.bf16.msra.mxu1 %v1230_v47 }
  0x5a   :  { %449 = vmatpush.bf16.msra.mxu2 %v1212_v41 }
  0x5c   :  { %383 = vmatpush.bf16.msra.mxu0 %v1303_v9 }
  0x5d   :  { %438 = vmatpush.bf16.msra.mxu1 %v1258_v56 }
  0x5e   :  { %450 = vmatpush.bf16.msra.mxu2 %v1240_v50 }
  0x60   :  { %384 = vmatpush.bf16.msra.mxu0 %v1318_v14 }
  0x61   :  { %439 = vmatpush.bf16.msra.mxu1 %v1286_v1 }
  0x62   :  { %451 = vmatpush.bf16.msra.mxu2 %v1268_v59 }
  0x66   :  { %452 = vmatpush.bf16.msra.mxu2 %v1298_v6 }
  0xa0   :  { %v197_v15 = vpop.f32.mrf.mxu0 }
  0xa3   :  { %v210_v16 = vpop.f32.mrf.mxu1 }
  0xa4   :  { %v229_v20 = vrot.slane %v210_v16, 7 }
  0xa6   :  { %v231_v21 = vsel %vm230_vm0, %v197_v15, %v229_v20 }
  0xa7   :  { %v233_v23 = vadd.f32 %v231_v21, %v58_v18 }
  0xa8   :  { %v199_v25 = vpop.f32.mrf.mxu0 }
  0xa9   :  { %v947_v24 = vmul.f32 -1.442695, %v233_v23 }
  0xab   :  { %987 = vpow2.f32 %v947_v24  ;;  %v212_v26 = vpop.f32.mrf.mxu1 }
  0xac   :  { %v223_v29 = vpop.f32.mrf.mxu2 }
  0xad   :  { %v253_v45 = vadd.f32 %v223_v29, %v1381_v39 }
  0xb1   :  { %v988_v30 = vpop.eup %987 }
  0xb2   :  { %v237_v32 = vadd.f32 1.0, %v988_v30 }
  0xb4   :  { %989 = vrcp.f32 %v237_v32  ;;  %v225_v33 = vpop.f32.mrf.mxu2  ;;  %v249_v40 = vand.u32 2147483648, %v237_v32  ;;  %v247_v43 = vand.u32 2147483647, %v237_v32  ;;  %vm243_vm2 = vweird.f32 %v237_v32 }
  0xb6   :  { %v250_v48 = vor.u32 1.1754944e-38, %v249_v40  ;;  %vm248_vm4 = vcmp.eq.f32.partialorder %v247_v43, 8.507059e+37 }
  0xba   :  { %v990_v34 = vpop.eup %989 }
  0xbb   :  { %v239_v35 = vmul.f32 %v990_v34, %v237_v32  ;;  %vm244_vm1 = vweird.f32 %v990_v34 }
  0xbc   :  { %vm245_vm3 = vmor %vm243_vm2, %vm244_vm1 }
  0xbd   :  { %v240_v36 = vsub.f32 1.0, %v239_v35 }
  0xbf   :  { %v241_v42 = vmul.f32 %v990_v34, %v240_v36 }
  0xc1   :  { %v242_v44 = vadd.f32 %v990_v34, %v241_v42  ;;  %v337_v42 = vrot.slane %v948_v8, 2 }
  0xc3   :  { %v246_v49 = vsel %vm245_vm3, %v990_v34, %v242_v44 }
  0xc4   :  { %v251_v52 = vsel %vm248_vm4, %v250_v48, %v246_v49 }
  0xc5   :  { %v254_v53 = vmul.f32 %v253_v45, %v251_v52  ;;  %v262_v60 = vrot.slane %v251_v52, 1 }
  0xc7   :  { %v258_v54 = vadd.f32 %v256_v51, %v254_v53 }
  0xc9   :  { %991 = vtanh.f32 %v258_v54 }
  0xcf   :  { %v992_v57 = vpop.eup %991 }
  0xd0   :  { %v260_v58 = vsub.f32 %v1288_v2, %v992_v57 }
  0xd2   :  { %v264_v61 = vmul.f32 %v262_v60, %v260_v58 }
  0xd4   :  { %v1385_v62 = vadd.f32 %v992_v57, %v264_v61  ;;  %v950_v61 = vld [vmem:[%s1551_s0 + $0x2] ss:$8 sm:$0x7] }
  0xd6   :  { %266 = vst [vmem:[#allocation3] sm:$0x1] %v1385_v62  ;;  %v269_v63 = vpack.c.bf16 %v1385_v62, %v1385_v62 }
  0xd8   :  { %278 = vmatmul.bf16.vlgmr.msra.gmra.mxu3 %v269_v63  ;;  %291 = vmatmul.bf16.vlgmr.msrb.gmra.mxu0 %v269_v63 }
  0xd9   :  { %304 = vmatmul.bf16.vlgmr.msrb.gmra.mxu1 %v269_v63  ;;  %458 = vmatpush.bf16.msra.mxu3 %v1153_v22 }
  0xda   :  { %513 = vmatpush.bf16.msrb.mxu0 %v1096_v3  ;;  %526 = vmatpush.bf16.msrb.mxu1 %v1107_v7 }
  0xdd   :  { %459 = vmatpush.bf16.msra.mxu3 %v1168_v27 }
  0xde   :  { %514 = vmatpush.bf16.msrb.mxu0 %v1116_v10  ;;  %527 = vmatpush.bf16.msrb.mxu1 %v1120_v11 }
  0xe1   :  { %460 = vmatpush.bf16.msra.mxu3 %v1199_v37 }
  0xe2   :  { %515 = vmatpush.bf16.msrb.mxu0 %v1138_v17  ;;  %528 = vmatpush.bf16.msrb.mxu1 %v1145_v19 }
  0xe5   :  { %461 = vmatpush.bf16.msra.mxu3 %v1227_v46 }
  0xe6   :  { %516 = vmatpush.bf16.msrb.mxu0 %v1171_v28  ;;  %529 = vmatpush.bf16.msrb.mxu1 %v1181_v31 }
  0xe9   :  { %462 = vmatpush.bf16.msra.mxu3 %v1255_v55 }
  0xea   :  { %517 = vmatpush.bf16.msrb.mxu0 %v1202_v38  ;;  %530 = vmatpush.bf16.msrb.mxu1 %v1212_v41 }
  0xed   :  { %463 = vmatpush.bf16.msra.mxu3 %v1283_v0 }
  0xee   :  { %518 = vmatpush.bf16.msrb.mxu0 %v1230_v47  ;;  %531 = vmatpush.bf16.msrb.mxu1 %v1240_v50 }
  0xf1   :  { %464 = vmatpush.bf16.msra.mxu3 %v1303_v9 }
  0xf2   :  { %519 = vmatpush.bf16.msrb.mxu0 %v1258_v56  ;;  %532 = vmatpush.bf16.msrb.mxu1 %v1268_v59 }
  0xf5   :  { %465 = vmatpush.bf16.msra.mxu3 %v1318_v14 }
  0xf6   :  { %520 = vmatpush.bf16.msrb.mxu0 %v1286_v1  ;;  %533 = vmatpush.bf16.msrb.mxu1 %v1298_v6 }
 0x155   :  { %v292_v2 = vpop.f32.mrf.mxu0 }
 0x156   :  { %v305_v4 = vpop.f32.mrf.mxu1  ;;  %v311_v5 = vrot.slane %v292_v2, 7 }
 0x157   :  { %v334_v36 = vadd.f32 %v305_v4, %v1381_v39 }
 0x15b   :  { %v279_v12 = vpop.f32.mrf.mxu3 }
 0x15c   :  { %v312_v13 = vsel %vm230_vm0, %v279_v12, %v311_v5 }
 0x15d   :  { %v314_v15 = vadd.f32 %v948_v8, %v312_v13  ;;  %v294_v16 = vpop.f32.mrf.mxu0 }
 0x15e   :  { %v307_v18 = vpop.f32.mrf.mxu1 }
 0x15f   :  { %v949_v20 = vmul.f32 -1.442695, %v314_v15 }
 0x161   :  { %993 = vpow2.f32 %v949_v20 }
 0x163   :  { %v281_v21 = vpop.f32.mrf.mxu3 }
 0x167   :  { %v994_v23 = vpop.eup %993 }
 0x168   :  { %v318_v24 = vadd.f32 1.0, %v994_v23 }
 0x16a   :  { %995 = vrcp.f32 %v318_v24  ;;  %v330_v30 = vand.u32 2147483648, %v318_v24  ;;  %v328_v33 = vand.u32 2147483647, %v318_v24  ;;  %vm324_vm6 = vweird.f32 %v318_v24 }
 0x16c   :  { %v331_v35 = vor.u32 1.1754944e-38, %v330_v30  ;;  %vm329_vm8 = vcmp.eq.f32.partialorder %v328_v33, 8.507059e+37 }
 0x170   :  { %v996_v25 = vpop.eup %995 }
 0x171   :  { %v320_v26 = vmul.f32 %v996_v25, %v318_v24  ;;  %vm325_vm5 = vweird.f32 %v996_v25 }
 0x172   :  { %vm326_vm7 = vmor %vm324_vm6, %vm325_vm5 }
 0x173   :  { %v321_v29 = vsub.f32 1.0, %v320_v26 }
 0x175   :  { %v322_v32 = vmul.f32 %v996_v25, %v321_v29 }
 0x177   :  { %v323_v34 = vadd.f32 %v996_v25, %v322_v32  ;;  %v418_v32 = vrot.slane %v950_v61, 2 }
 0x179   :  { %v327_v40 = vsel %vm326_vm7, %v996_v25, %v323_v34 }
 0x17a   :  { %v332_v43 = vsel %vm329_vm8, %v331_v35, %v327_v40 }
 0x17b   :  { %v335_v44 = vmul.f32 %v334_v36, %v332_v43  ;;  %v343_v49 = vrot.slane %v332_v43, 1 }
 0x17d   :  { %v339_v45 = vadd.f32 %v337_v42, %v335_v44 }
 0x17f   :  { %997 = vtanh.f32 %v339_v45 }
 0x185   :  { %v998_v48 = vpop.eup %997 }
 0x186   :  { %v341_v51 = vsub.f32 %v1385_v62, %v998_v48 }
 0x188   :  { %v345_v52 = vmul.f32 %v343_v49, %v341_v51  ;;  %v952_v51 = vld [vmem:[%s1551_s0 + $0x3] ss:$8 sm:$0x7] }
 0x18a   :  { %v1420_v53 = vadd.f32 %v998_v48, %v345_v52 }
 0x18c   :  { %347 = vst [vmem:[#allocation3 + $0x1] sm:$0x1] %v1420_v53  ;;  %v350_v54 = vpack.c.bf16 %v1420_v53, %v1420_v53 }
 0x18e   :  { %359 = vmatmul.bf16.vlgmr.msrb.gmra.mxu2 %v350_v54  ;;  %372 = vmatmul.bf16.vlgmr.msrb.gmra.mxu3 %v350_v54 }
 0x18f   :  { %385 = vmatmul.bf16.vlgmr.msra.gmra.mxu0 %v350_v54  ;;  %539 = vmatpush.bf16.msrb.mxu2 %v1153_v22 }
 0x190   :  { %594 = vmatpush.bf16.msrb.mxu3 %v1096_v3  ;;  %607 = vmatpush.bf16.msra.mxu0 %v1107_v7 }
 0x193   :  { %540 = vmatpush.bf16.msrb.mxu2 %v1168_v27 }
 0x194   :  { %595 = vmatpush.bf16.msrb.mxu3 %v1116_v10  ;;  %608 = vmatpush.bf16.msra.mxu0 %v1120_v11 }
 0x197   :  { %541 = vmatpush.bf16.msrb.mxu2 %v1199_v37 }
 0x198   :  { %596 = vmatpush.bf16.msrb.mxu3 %v1138_v17  ;;  %609 = vmatpush.bf16.msra.mxu0 %v1145_v19 }
 0x19b   :  { %542 = vmatpush.bf16.msrb.mxu2 %v1227_v46 }
 0x19c   :  { %597 = vmatpush.bf16.msrb.mxu3 %v1171_v28  ;;  %610 = vmatpush.bf16.msra.mxu0 %v1181_v31 }
 0x19f   :  { %543 = vmatpush.bf16.msrb.mxu2 %v1255_v55 }
 0x1a0   :  { %598 = vmatpush.bf16.msrb.mxu3 %v1202_v38  ;;  %611 = vmatpush.bf16.msra.mxu0 %v1212_v41 }
 0x1a3   :  { %544 = vmatpush.bf16.msrb.mxu2 %v1283_v0 }
 0x1a4   :  { %599 = vmatpush.bf16.msrb.mxu3 %v1230_v47  ;;  %612 = vmatpush.bf16.msra.mxu0 %v1240_v50 }
 0x1a7   :  { %545 = vmatpush.bf16.msrb.mxu2 %v1303_v9 }
 0x1a8   :  { %600 = vmatpush.bf16.msrb.mxu3 %v1258_v56  ;;  %613 = vmatpush.bf16.msra.mxu0 %v1268_v59 }
 0x1ab   :  { %546 = vmatpush.bf16.msrb.mxu2 %v1318_v14 }
 0x1ac   :  { %601 = vmatpush.bf16.msrb.mxu3 %v1286_v1  ;;  %614 = vmatpush.bf16.msra.mxu0 %v1298_v6 }
 0x20c   :  { %v386_v57 = vpop.f32.mrf.mxu0 }
 0x20d   :  { %v415_v29 = vadd.f32 %v386_v57, %v1381_v39 }
 0x211   :  { %v360_v58 = vpop.f32.mrf.mxu2  ;;  %v373_v60 = vpop.f32.mrf.mxu3 }
 0x212   :  { %v392_v62 = vrot.slane %v373_v60, 7 }
 0x214   :  { %v393_v63 = vsel %vm230_vm0, %v360_v58, %v392_v62  ;;  %v388_v2 = vpop.f32.mrf.mxu0 }
 0x215   :  { %v395_v4 = vadd.f32 %v950_v61, %v393_v63 }
 0x217   :  { %v951_v5 = vmul.f32 -1.442695, %v395_v4 }
 0x219   :  { %999 = vpow2.f32 %v951_v5  ;;  %v362_v8 = vpop.f32.mrf.mxu2  ;;  %v375_v12 = vpop.f32.mrf.mxu3 }
 0x21f   :  { %v1000_v13 = vpop.eup %999 }
 0x220   :  { %v399_v15 = vadd.f32 1.0, %v1000_v13 }
 0x222   :  { %1001 = vrcp.f32 %v399_v15  ;;  %v411_v21 = vand.u32 2147483648, %v399_v15  ;;  %v409_v24 = vand.u32 2147483647, %v399_v15  ;;  %vm405_vm10 = vweird.f32 %v399_v15 }
 0x224   :  { %v412_v26 = vor.u32 1.1754944e-38, %v411_v21  ;;  %vm410_vm12 = vcmp.eq.f32.partialorder %v409_v24, 8.507059e+37 }
 0x228   :  { %v1002_v16 = vpop.eup %1001 }
 0x229   :  { %v401_v18 = vmul.f32 %v1002_v16, %v399_v15  ;;  %vm406_vm9 = vweird.f32 %v1002_v16 }
 0x22a   :  { %vm407_vm11 = vmor %vm405_vm10, %vm406_vm9 }
 0x22b   :  { %v402_v20 = vsub.f32 1.0, %v401_v18 }
 0x22d   :  { %v403_v23 = vmul.f32 %v1002_v16, %v402_v20 }
 0x22f   :  { %v404_v25 = vadd.f32 %v1002_v16, %v403_v23  ;;  %v499_v23 = vrot.slane %v952_v51, 2 }
 0x231   :  { %v408_v30 = vsel %vm407_vm11, %v1002_v16, %v404_v25 }
 0x232   :  { %v413_v33 = vsel %vm410_vm12, %v412_v26, %v408_v30 }
 0x233   :  { %v416_v34 = vmul.f32 %v415_v29, %v413_v33  ;;  %v424_v40 = vrot.slane %v413_v33, 1 }
 0x235   :  { %v420_v35 = vadd.f32 %v418_v32, %v416_v34 }
 0x237   :  { %1003 = vtanh.f32 %v420_v35 }
 0x23d   :  { %v1004_v36 = vpop.eup %1003 }
 0x23e   :  { %v422_v42 = vsub.f32 %v1420_v53, %v1004_v36 }
 0x240   :  { %v426_v43 = vmul.f32 %v424_v40, %v422_v42 }
 0x242   :  { %v1455_v44 = vadd.f32 %v1004_v36, %v426_v43 }
 0x244   :  { %428 = vst [vmem:[#allocation3 + $0x2] sm:$0x1] %v1455_v44  ;;  %v431_v45 = vpack.c.bf16 %v1455_v44, %v1455_v44 }
 0x246   :  { %440 = vmatmul.bf16.vlgmr.msra.gmra.mxu1 %v431_v45  ;;  %453 = vmatmul.bf16.vlgmr.msra.gmra.mxu2 %v431_v45 }
 0x247   :  { %466 = vmatmul.bf16.vlgmr.msra.gmra.mxu3 %v431_v45  ;;  %620 = vmatpush.bf16.msra.mxu1 %v1153_v22 }
 0x248   :  { %675 = vmatpush.bf16.msra.mxu2 %v1096_v3  ;;  %688 = vmatpush.bf16.msra.mxu3 %v1107_v7 }
 0x24b   :  { %621 = vmatpush.bf16.msra.mxu1 %v1168_v27 }
 0x24c   :  { %676 = vmatpush.bf16.msra.mxu2 %v1116_v10  ;;  %689 = vmatpush.bf16.msra.mxu3 %v1120_v11 }
 0x24f   :  { %622 = vmatpush.bf16.msra.mxu1 %v1199_v37 }
 0x250   :  { %677 = vmatpush.bf16.msra.mxu2 %v1138_v17  ;;  %690 = vmatpush.bf16.msra.mxu3 %v1145_v19 }
 0x253   :  { %623 = vmatpush.bf16.msra.mxu1 %v1227_v46 }
 0x254   :  { %678 = vmatpush.bf16.msra.mxu2 %v1171_v28  ;;  %691 = vmatpush.bf16.msra.mxu3 %v1181_v31 }
 0x257   :  { %624 = vmatpush.bf16.msra.mxu1 %v1255_v55 }
 0x258   :  { %679 = vmatpush.bf16.msra.mxu2 %v1202_v38  ;;  %692 = vmatpush.bf16.msra.mxu3 %v1212_v41 }
 0x25b   :  { %625 = vmatpush.bf16.msra.mxu1 %v1283_v0 }
 0x25c   :  { %680 = vmatpush.bf16.msra.mxu2 %v1230_v47  ;;  %693 = vmatpush.bf16.msra.mxu3 %v1240_v50 }
 0x25f   :  { %626 = vmatpush.bf16.msra.mxu1 %v1303_v9 }
 0x260   :  { %681 = vmatpush.bf16.msra.mxu2 %v1258_v56  ;;  %694 = vmatpush.bf16.msra.mxu3 %v1268_v59 }
 0x263   :  { %627 = vmatpush.bf16.msra.mxu1 %v1318_v14 }
 0x264   :  { %682 = vmatpush.bf16.msra.mxu2 %v1286_v1  ;;  %695 = vmatpush.bf16.msra.mxu3 %v1298_v6 }
 0x2c3   :  { %v441_v48 = vpop.f32.mrf.mxu1 }
 0x2c9   :  { %v454_v49 = vpop.f32.mrf.mxu2 }
 0x2ca   :  { %v473_v52 = vrot.slane %v454_v49, 7  ;;  %v467_v53 = vpop.f32.mrf.mxu3 }
 0x2cb   :  { %v443_v54 = vpop.f32.mrf.mxu1  ;;  %v496_v21 = vadd.f32 %v467_v53, %v1381_v39 }
 0x2cc   :  { %v474_v57 = vsel %vm230_vm0, %v441_v48, %v473_v52 }
 0x2cd   :  { %v476_v58 = vadd.f32 %v952_v51, %v474_v57 }
 0x2cf   :  { %v953_v60 = vmul.f32 -1.442695, %v476_v58 }
 0x2d1   :  { %1005 = vpow2.f32 %v953_v60  ;;  %v456_v61 = vpop.f32.mrf.mxu2 }
 0x2d2   :  { %v469_v62 = vpop.f32.mrf.mxu3 }
 0x2d7   :  { %v1006_v63 = vpop.eup %1005 }
 0x2d8   :  { %v480_v2 = vadd.f32 1.0, %v1006_v63 }
 0x2da   :  { %1007 = vrcp.f32 %v480_v2  ;;  %v492_v12 = vand.u32 2147483648, %v480_v2  ;;  %v490_v15 = vand.u32 2147483647, %v480_v2  ;;  %vm486_vm14 = vweird.f32 %v480_v2 }
 0x2dc   :  { %v493_v18 = vor.u32 1.1754944e-38, %v492_v12  ;;  %vm491_vm1 = vcmp.eq.f32.partialorder %v490_v15, 8.507059e+37 }
 0x2e0   :  { %v1008_v4 = vpop.eup %1007 }
 0x2e1   :  { %v482_v5 = vmul.f32 %v1008_v4, %v480_v2  ;;  %vm487_vm13 = vweird.f32 %v1008_v4 }
 0x2e2   :  { %vm488_vm15 = vmor %vm486_vm14, %vm487_vm13 }
 0x2e3   :  { %v483_v8 = vsub.f32 1.0, %v482_v5 }
 0x2e5   :  { %v484_v13 = vmul.f32 %v1008_v4, %v483_v8 }
 0x2e7   :  { %v485_v16 = vadd.f32 %v1008_v4, %v484_v13 }
 0x2e9   :  { %v489_v20 = vsel %vm488_vm15, %v1008_v4, %v485_v16 }
 0x2ea   :  { %v494_v24 = vsel %vm491_vm1, %v493_v18, %v489_v20 }
 0x2eb   :  { %v497_v25 = vmul.f32 %v496_v21, %v494_v24  ;;  %v505_v32 = vrot.slane %v494_v24, 1 }
 0x2ed   :  { %v501_v26 = vadd.f32 %v499_v23, %v497_v25 }
 0x2ef   :  { %1009 = vtanh.f32 %v501_v26 }
 0x2f5   :  { %v1010_v29 = vpop.eup %1009 }
 0x2f6   :  { %v503_v30 = vsub.f32 %v1455_v44, %v1010_v29 }
 0x2f8   :  { %v507_v33 = vmul.f32 %v505_v32, %v503_v30 }
 0x2fa   :  { %v1490_v34 = vadd.f32 %v1010_v29, %v507_v33 }
 0x2fc   :  { %509 = vst [vmem:[#allocation3 + $0x3] sm:$0x1] %v1490_v34  ;;  %v512_v35 = vpack.c.bf16 %v1490_v34, %v1490_v34 }
 0x2fe   :  { %521 = vmatmul.bf16.vlgmr.msrb.gmra.mxu0 %v512_v35  ;;  %534 = vmatmul.bf16.vlgmr.msrb.gmra.mxu1 %v512_v35 }
 0x2ff   :  { %547 = vmatmul.bf16.vlgmr.msrb.gmra.mxu2 %v512_v35  ;;  %701 = vmatpush.bf16.msrb.mxu0 %v1153_v22 }
 0x300   :  { %756 = vmatpush.bf16.msrb.mxu1 %v1096_v3  ;;  %769 = vmatpush.bf16.msrb.mxu2 %v1107_v7 }
 0x303   :  { %702 = vmatpush.bf16.msrb.mxu0 %v1168_v27 }
 0x304   :  { %757 = vmatpush.bf16.msrb.mxu1 %v1116_v10  ;;  %770 = vmatpush.bf16.msrb.mxu2 %v1120_v11  ;;  %v954_v10 = vld [vmem:[%s1551_s0 + $0x4] ss:$8 sm:$0x7] }
 0x305   :  { %v580_v49 = vrot.slane %v954_v10, 2 }
 0x307   :  { %703 = vmatpush.bf16.msrb.mxu0 %v1199_v37 }
 0x308   :  { %758 = vmatpush.bf16.msrb.mxu1 %v1138_v17  ;;  %771 = vmatpush.bf16.msrb.mxu2 %v1145_v19 }
 0x30b   :  { %704 = vmatpush.bf16.msrb.mxu0 %v1227_v46 }
 0x30c   :  { %759 = vmatpush.bf16.msrb.mxu1 %v1171_v28  ;;  %772 = vmatpush.bf16.msrb.mxu2 %v1181_v31 }
 0x30f   :  { %705 = vmatpush.bf16.msrb.mxu0 %v1255_v55 }
 0x310   :  { %760 = vmatpush.bf16.msrb.mxu1 %v1202_v38  ;;  %773 = vmatpush.bf16.msrb.mxu2 %v1212_v41 }
 0x313   :  { %706 = vmatpush.bf16.msrb.mxu0 %v1283_v0 }
 0x314   :  { %761 = vmatpush.bf16.msrb.mxu1 %v1230_v47  ;;  %774 = vmatpush.bf16.msrb.mxu2 %v1240_v50 }
 0x317   :  { %707 = vmatpush.bf16.msrb.mxu0 %v1303_v9 }
 0x318   :  { %762 = vmatpush.bf16.msrb.mxu1 %v1258_v56  ;;  %775 = vmatpush.bf16.msrb.mxu2 %v1268_v59 }
 0x31b   :  { %708 = vmatpush.bf16.msrb.mxu0 %v1318_v14 }
 0x31c   :  { %763 = vmatpush.bf16.msrb.mxu1 %v1286_v1  ;;  %776 = vmatpush.bf16.msrb.mxu2 %v1298_v6 }
 0x37b   :  { %v522_v3 = vpop.f32.mrf.mxu0  ;;  %v535_v7 = vpop.f32.mrf.mxu1 }
 0x37c   :  { %v554_v11 = vrot.slane %v535_v7, 7 }
 0x37e   :  { %v555_v17 = vsel %vm230_vm0, %v522_v3, %v554_v11 }
 0x37f   :  { %v557_v19 = vadd.f32 %v954_v10, %v555_v17 }
 0x381   :  { %v955_v28 = vmul.f32 -1.442695, %v557_v19 }
 0x382   :  { %v548_v31 = vpop.f32.mrf.mxu2 }
 0x383   :  { %1011 = vpow2.f32 %v955_v28  ;;  %v524_v38 = vpop.f32.mrf.mxu0  ;;  %v537_v41 = vpop.f32.mrf.mxu1  ;;  %v577_v48 = vadd.f32 %v548_v31, %v1381_v39  ;;  %v958_v28 = vld [vmem:[%s1551_s0 + $0x6] ss:$8 sm:$0x7] }
 0x389   :  { %v1012_v47 = vpop.eup %1011 }
 0x38a   :  { %v561_v50 = vadd.f32 1.0, %v1012_v47  ;;  %v550_v56 = vpop.f32.mrf.mxu2 }
 0x38c   :  { %1013 = vrcp.f32 %v561_v50  ;;  %v573_v36 = vand.u32 2147483648, %v561_v50  ;;  %v571_v42 = vand.u32 2147483647, %v561_v50  ;;  %vm567_vm3 = vweird.f32 %v561_v50 }
 0x38e   :  { %v574_v44 = vor.u32 1.1754944e-38, %v573_v36  ;;  %vm572_vm5 = vcmp.eq.f32.partialorder %v571_v42, 8.507059e+37 }
 0x392   :  { %v1014_v59 = vpop.eup %1013 }
 0x393   :  { %v563_v1 = vmul.f32 %v1014_v59, %v561_v50  ;;  %vm568_vm2 = vweird.f32 %v1014_v59 }
 0x394   :  { %vm569_vm4 = vmor %vm567_vm3, %vm568_vm2 }
 0x395   :  { %v564_v6 = vsub.f32 1.0, %v563_v1 }
 0x397   :  { %v565_v40 = vmul.f32 %v1014_v59, %v564_v6 }
 0x399   :  { %v566_v43 = vadd.f32 %v1014_v59, %v565_v40 }
 0x39b   :  { %v570_v45 = vsel %vm569_vm4, %v1014_v59, %v566_v43 }
 0x39c   :  { %v575_v51 = vsel %vm572_vm5, %v574_v44, %v570_v45 }
 0x39d   :  { %v578_v52 = vmul.f32 %v577_v48, %v575_v51  ;;  %v586_v58 = vrot.slane %v575_v51, 1 }
 0x39f   :  { %v582_v53 = vadd.f32 %v580_v49, %v578_v52 }
 0x3a1   :  { %1015 = vtanh.f32 %v582_v53  ;;  %v742_v53 = vrot.slane %v958_v28, 2 }
 0x3a7   :  { %v1016_v54 = vpop.eup %1015 }
 0x3a8   :  { %v584_v57 = vsub.f32 %v1490_v34, %v1016_v54 }
 0x3aa   :  { %v588_v60 = vmul.f32 %v586_v58, %v584_v57 }
 0x3ac   :  { %v589_v61 = vadd.f32 %v1016_v54, %v588_v60 }
 0x3ae   :  { %590 = vst [vmem:[#allocation3 + $0x4] sm:$0x1] %v589_v61  ;;  %v593_v62 = vpack.c.bf16 %v589_v61, %v589_v61 }
 0x3b0   :  { %602 = vmatmul.bf16.vlgmr.msrb.gmra.mxu3 %v593_v62  ;;  %615 = vmatmul.bf16.vlgmr.msra.gmra.mxu0 %v593_v62 }
 0x3b1   :  { %628 = vmatmul.bf16.vlgmr.msra.gmra.mxu1 %v593_v62  ;;  %782 = vmatpush.bf16.msrb.mxu3 %v1153_v22  ;;  %v956_v22 = vld [vmem:[%s1551_s0 + $0x5] ss:$8 sm:$0x7] }
 0x3b2   :  { %v661_v26 = vrot.slane %v956_v22, 2 }
 0x3b5   :  { %783 = vmatpush.bf16.msrb.mxu3 %v1168_v27 }
 0x3b9   :  { %784 = vmatpush.bf16.msrb.mxu3 %v1199_v37 }
 0x3bd   :  { %785 = vmatpush.bf16.msrb.mxu3 %v1227_v46 }
 0x3c1   :  { %786 = vmatpush.bf16.msrb.mxu3 %v1255_v55 }
 0x3c5   :  { %787 = vmatpush.bf16.msrb.mxu3 %v1283_v0 }
 0x3c9   :  { %788 = vmatpush.bf16.msrb.mxu3 %v1303_v9 }
 0x3cd   :  { %789 = vmatpush.bf16.msrb.mxu3 %v1318_v14 }
 0x42d   :  { %v616_v63 = vpop.f32.mrf.mxu0 }
 0x42e   :  { %v629_v2 = vpop.f32.mrf.mxu1  ;;  %v635_v4 = vrot.slane %v616_v63, 7 }
 0x42f   :  { %v658_v24 = vadd.f32 %v629_v2, %v1381_v39 }
 0x433   :  { %v603_v27 = vpop.f32.mrf.mxu3 }
 0x434   :  { %v636_v37 = vsel %vm230_vm0, %v603_v27, %v635_v4 }
 0x435   :  { %v638_v5 = vadd.f32 %v956_v22, %v636_v37  ;;  %v618_v46 = vpop.f32.mrf.mxu0  ;;  %v960_v37 = vld [vmem:[%s1551_s0 + $0x7] ss:$8 sm:$0x7]  ;;  %s1061_s0 = smov [#allocation3]  }
 0x436   :  { %v631_v8 = vpop.f32.mrf.mxu1  ;;  %s840_s22 = sshll.u32 %s1061_s0, 4  ;;  %s841_s22 = int_to_ptr.vmem [resolvable:$true] %s840_s22 }
 0x437   :  { %v957_v55 = vmul.f32 -1.442695, %v638_v5 }
 0x439   :  { %1017 = vpow2.f32 %v957_v55 }
 0x43b   :  { %v605_v0 = vpop.f32.mrf.mxu3 }
 0x43f   :  { %v1018_v12 = vpop.eup %1017 }
 0x440   :  { %v642_v9 = vadd.f32 1.0, %v1018_v12 }
 0x442   :  { %1019 = vrcp.f32 %v642_v9  ;;  %v654_v16 = vand.u32 2147483648, %v642_v9  ;;  %v652_v20 = vand.u32 2147483647, %v642_v9  ;;  %vm648_vm7 = vweird.f32 %v642_v9 }
 0x444   :  { %v655_v23 = vor.u32 1.1754944e-38, %v654_v16  ;;  %vm653_vm9 = vcmp.eq.f32.partialorder %v652_v20, 8.507059e+37 }
 0x448   :  { %v1020_v14 = vpop.eup %1019 }
 0x449   :  { %v644_v13 = vmul.f32 %v1020_v14, %v642_v9  ;;  %vm649_vm6 = vweird.f32 %v1020_v14 }
 0x44a   :  { %vm650_vm8 = vmor %vm648_vm7, %vm649_vm6 }
 0x44b   :  { %v645_v15 = vsub.f32 1.0, %v644_v13 }
 0x44d   :  { %v646_v18 = vmul.f32 %v1020_v14, %v645_v15 }
 0x44f   :  { %v647_v21 = vadd.f32 %v1020_v14, %v646_v18 }
 0x451   :  { %v651_v25 = vsel %vm650_vm8, %v1020_v14, %v647_v21 }
 0x452   :  { %v656_v29 = vsel %vm653_vm9, %v655_v23, %v651_v25 }
 0x453   :  { %v659_v30 = vmul.f32 %v658_v24, %v656_v29  ;;  %v667_v35 = vrot.slane %v656_v29, 1 }
 0x455   :  { %v663_v32 = vadd.f32 %v661_v26, %v659_v30 }
 0x457   :  { %1021 = vtanh.f32 %v663_v32  ;;  %v823_v32 = vrot.slane %v960_v37, 2 }
 0x45d   :  { %v1022_v33 = vpop.eup %1021 }
 0x45e   :  { %v665_v34 = vsub.f32 %v589_v61, %v1022_v33 }
 0x460   :  { %v669_v3 = vmul.f32 %v667_v35, %v665_v34 }
 0x462   :  { %v670_v7 = vadd.f32 %v1022_v33, %v669_v3 }
 0x464   :  { %671 = vst [vmem:[#allocation3 + $0x5] sm:$0x1] %v670_v7  ;;  %v674_v10 = vpack.c.bf16 %v670_v7, %v670_v7 }
 0x466   :  { %683 = vmatmul.bf16.vlgmr.msra.gmra.mxu2 %v674_v10  ;;  %696 = vmatmul.bf16.vlgmr.msra.gmra.mxu3 %v674_v10 }
 0x467   :  { %709 = vmatmul.bf16.vlgmr.msrb.gmra.mxu0 %v674_v10 }
 0x4e4   :  { %v710_v11 = vpop.f32.mrf.mxu0 }
 0x4e5   :  { %v739_v51 = vadd.f32 %v710_v11, %v1381_v39 }
 0x4e9   :  { %v684_v17 = vpop.f32.mrf.mxu2  ;;  %v697_v19 = vpop.f32.mrf.mxu3 }
 0x4ea   :  { %v716_v31 = vrot.slane %v697_v19, 7 }
 0x4ec   :  { %v717_v38 = vsel %vm230_vm0, %v684_v17, %v716_v31  ;;  %v712_v41 = vpop.f32.mrf.mxu0 }
 0x4ed   :  { %v719_v47 = vadd.f32 %v958_v28, %v717_v38 }
 0x4ef   :  { %v959_v50 = vmul.f32 -1.442695, %v719_v47 }
 0x4f1   :  { %1023 = vpow2.f32 %v959_v50  ;;  %v686_v56 = vpop.f32.mrf.mxu2  ;;  %v699_v59 = vpop.f32.mrf.mxu3 }
 0x4f7   :  { %v1024_v1 = vpop.eup %1023 }
 0x4f8   :  { %v723_v6 = vadd.f32 1.0, %v1024_v1 }
 0x4fa   :  { %1025 = vrcp.f32 %v723_v6  ;;  %v735_v43 = vand.u32 2147483648, %v723_v6  ;;  %v733_v45 = vand.u32 2147483647, %v723_v6  ;;  %vm729_vm11 = vweird.f32 %v723_v6 }
 0x4fc   :  { %v736_v49 = vor.u32 1.1754944e-38, %v735_v43  ;;  %vm734_vm13 = vcmp.eq.f32.partialorder %v733_v45, 8.507059e+37 }
 0x500   :  { %v1026_v36 = vpop.eup %1025 }
 0x501   :  { %v725_v40 = vmul.f32 %v1026_v36, %v723_v6  ;;  %vm730_vm10 = vweird.f32 %v1026_v36 }
 0x502   :  { %vm731_vm12 = vmor %vm729_vm11, %vm730_vm10 }
 0x503   :  { %v726_v42 = vsub.f32 1.0, %v725_v40 }
 0x505   :  { %v727_v44 = vmul.f32 %v1026_v36, %v726_v42 }
 0x507   :  { %v728_v48 = vadd.f32 %v1026_v36, %v727_v44 }
 0x509   :  { %v732_v52 = vsel %vm731_vm12, %v1026_v36, %v728_v48 }
 0x50a   :  { %v737_v54 = vsel %vm734_vm13, %v736_v49, %v732_v52 }
 0x50b   :  { %v740_v57 = vmul.f32 %v739_v51, %v737_v54  ;;  %v748_v61 = vrot.slane %v737_v54, 1 }
 0x50d   :  { %v744_v58 = vadd.f32 %v742_v53, %v740_v57 }
 0x50f   :  { %1027 = vtanh.f32 %v744_v58 }
 0x515   :  { %v1028_v60 = vpop.eup %1027 }
 0x516   :  { %v746_v62 = vsub.f32 %v670_v7, %v1028_v60 }
 0x518   :  { %v750_v63 = vmul.f32 %v748_v61, %v746_v62 }
 0x51a   :  { %v751_v2 = vadd.f32 %v1028_v60, %v750_v63 }
 0x51c   :  { %752 = vst [vmem:[#allocation3 + $0x6] sm:$0x1] %v751_v2  ;;  %v755_v4 = vpack.c.bf16 %v751_v2, %v751_v2 }
 0x51e   :  { %764 = vmatmul.bf16.vlgmr.msrb.gmra.mxu1 %v755_v4  ;;  %777 = vmatmul.bf16.vlgmr.msrb.gmra.mxu2 %v755_v4 }
 0x51f   :  { %790 = vmatmul.bf16.vlgmr.msrb.gmra.mxu3 %v755_v4 }
 0x59b   :  { %v765_v22 = vpop.f32.mrf.mxu1 }
 0x5a1   :  { %v778_v27 = vpop.f32.mrf.mxu2 }
 0x5a2   :  { %v797_v5 = vrot.slane %v778_v27, 7  ;;  %v791_v46 = vpop.f32.mrf.mxu3 }
 0x5a3   :  { %v767_v8 = vpop.f32.mrf.mxu1  ;;  %v820_v30 = vadd.f32 %v791_v46, %v1381_v39 }
 0x5a4   :  { %v798_v55 = vsel %vm230_vm0, %v765_v22, %v797_v5 }
 0x5a5   :  { %v800_v0 = vadd.f32 %v960_v37, %v798_v55 }
 0x5a7   :  { %v961_v12 = vmul.f32 -1.442695, %v800_v0 }
 0x5a9   :  { %1029 = vpow2.f32 %v961_v12  ;;  %v780_v9 = vpop.f32.mrf.mxu2 }
 0x5aa   :  { %v793_v14 = vpop.f32.mrf.mxu3 }
 0x5af   :  { %v1030_v13 = vpop.eup %1029 }
 0x5b0   :  { %v804_v15 = vadd.f32 1.0, %v1030_v13 }
 0x5b2   :  { %1031 = vrcp.f32 %v804_v15  ;;  %v816_v21 = vand.u32 2147483648, %v804_v15  ;;  %v814_v24 = vand.u32 2147483647, %v804_v15  ;;  %vm810_vm15 = vweird.f32 %v804_v15 }
 0x5b4   :  { %v817_v26 = vor.u32 1.1754944e-38, %v816_v21  ;;  %vm815_vm0 = vcmp.eq.f32.partialorder %v814_v24, 8.507059e+37 }
 0x5b8   :  { %v1032_v16 = vpop.eup %1031 }
 0x5b9   :  { %v806_v18 = vmul.f32 %v1032_v16, %v804_v15  ;;  %vm811_vm14 = vweird.f32 %v1032_v16 }
 0x5ba   :  { %vm812_vm1 = vmor %vm810_vm15, %vm811_vm14 }
 0x5bb   :  { %v807_v20 = vsub.f32 1.0, %v806_v18 }
 0x5bd   :  { %v808_v23 = vmul.f32 %v1032_v16, %v807_v20 }
 0x5bf   :  { %v809_v25 = vadd.f32 %v1032_v16, %v808_v23 }
 0x5c1   :  { %v813_v29 = vsel %vm812_vm1, %v1032_v16, %v809_v25 }
 0x5c2   :  { %v818_v33 = vsel %vm815_vm0, %v817_v26, %v813_v29 }
 0x5c3   :  { %v821_v34 = vmul.f32 %v820_v30, %v818_v33  ;;  %v829_v10 = vrot.slane %v818_v33, 1 }
 0x5c5   :  { %v825_v35 = vadd.f32 %v823_v32, %v821_v34 }
 0x5c7   :  { %1033 = vtanh.f32 %v825_v35 }
 0x5cd   :  { %v1034_v3 = vpop.eup %1033 }
 0x5ce   :  { %v827_v7 = vsub.f32 %v751_v2, %v1034_v3 }
 0x5d0   :  { %v831_v11 = vmul.f32 %v829_v10, %v827_v7 }
 0x5d2   :  { %v832_v17 = vadd.f32 %v1034_v3, %v831_v11 }
 0x5d4   :  { %833 = vst [vmem:[#allocation3 + $0x7] sm:$0x1] %v832_v17 }
 0x5d5   :  { %834 = vst [vmem:[#allocation2] sm:$0x1] %v832_v17  ;;  %845 = dma.vmem_to_hbm [thread:$0]  %s841_s22, 128, %s843_s25, [#allocation4]  }
 0x5d6   :  { %1059 = dma.done.wait [#allocation4], 128  }
 0x5d7   :  { %1060 = vsyncadd [#allocation4], 4294967168 }
 0x5d8   :  { %850 = vsyncpa [#allocation4], 1 }

</bundles_post_ra>
